<compile_context>
chip_gen: v7x
topology: tpu7x:2x2x1
jax: 0.10.0
libtpu: 0.0.40
codegen_flags: <defaults>
</compile_context>

<pallas_src>
import functools

import numpy as np
import jax
import jax.numpy as jnp
from jax import lax
from jax.experimental import pallas as pl
from jax.experimental.pallas import tpu as pltpu


def _round_up(x, m):
    return (x + m - 1) // m * m


# ----------------------------- Pallas kernel ------------------------------- #

def _causal_conv1d_kernel(C_in, C_out, K, dilation, pad,
                          x_ref, p_ref, y_ref, carry_ref):
    """One (batch-block, length-tile) grid step.

    x_ref    : (C_in, Bt, LT)   current length tile, batch packed on sublanes
    p_ref    : (C_out*C_in*K + C_out,) f32 in SMEM  -- flattened taps, then bias
    y_ref    : (C_out, Bt, LT)
    carry_ref: (C_in, Bt, 128)  last 128 lanes of the previous length tile
                                (causal left context; zero at the first tile)
    """
    CW = 128
    Bt = x_ref.shape[1]
    LT = x_ref.shape[2]

    # Zero left context at the start of every batch block.  The length axis is
    # the innermost ("arbitrary") grid axis, so this also resets the carry
    # between batch blocks and prevents cross-batch context leaks.
    @pl.when(pl.program_id(1) == 0)
    def _():
        carry_ref[...] = jnp.zeros_like(carry_ref)

    cur = x_ref[...]                                            # (C_in, Bt, LT)
    win = jnp.concatenate([carry_ref[...], cur], axis=-1)       # (C_in, Bt, CW+LT)
    # Carry the causal left context for the next length tile (LT >= CW).
    carry_ref[...] = cur[:, :, LT - CW:]

    # K*C_in shifted taps (lane shifts of <= pad <= 128), computed once and
    # reused across all output channels.  Pure VPU work; no MXU push and no
    # stacked contraction buffer.
    taps = []
    for ci in range(C_in):
        w_ci = win[ci]                                          # (Bt, CW+LT)
        row = []
        for j in range(K):
            s = pad - j * dilation                              # left shift of tap j
            row.append(cur[ci] if s == 0 else w_ci[:, CW - s: CW - s + LT])
        taps.append(row)

    n_w = C_out * C_in * K
    for co in range(C_out):
        acc = jnp.zeros((Bt, LT), jnp.float32)
        for ci in range(C_in):
            base = (co * C_in + ci) * K
            for j in range(K):
                acc = acc + p_ref[base + j] * taps[ci][j]       # scalar * (Bt, LT)
        y_ref[co] = (acc + p_ref[n_w + co]).astype(y_ref.dtype)


# ------------------------------ host wrapper -------------------------------- #

def causal_conv1d(x, weight, bias, *, dilation=1, lane_tile=None, batch_tile=None):
    """CausalConv1D.forward:  Conv1d(padding=(K-1)*d) followed by [..., :-pad].

    x      : (B, C_in, L)        float32
    weight : (C_out, C_in, K)    PyTorch Conv1d weight layout
    bias   : (C_out,)
    returns: (B, C_out, L)
    """
    B, C_in, L = x.shape
    C_out, C_in_w, K = weight.shape
    assert C_in_w == C_in
    pad = (K - 1) * dilation
    # PyTorch's x[:, :, :-0] for kernel_size=1 yields an empty tensor; we
    # require a real causal receptive field instead of reproducing that.
    assert pad >= 1, "kernel_size must be >= 2 (padding=0 is degenerate in the module)"
    # TODO(synk): support (K-1)*dilation > 128 by carrying a wider context.
    assert pad <= 128, "causal receptive field wider than one 128-lane carry tile"
    # TODO(synk): add an MXU path for large channel counts (unrolled VPU loop).
    assert C_out * C_in * K <= 4096

    # ---- tiling ---------------------------------------------------------- #
    if lane_tile is None:
        lane_tile = min(2048, _round_up(L, 128))
    LT = int(lane_tile)
    assert LT % 128 == 0 and LT >= 128
    if batch_tile is None:
        batch_tile = B if B <= 8 else min(64, (B // 8) * 8)
    Bt = int(min(batch_tile, B))
    assert Bt == B or Bt % 8 == 0
    n_b = pl.cdiv(B, Bt)
    n_l = pl.cdiv(L, LT)

    # ---- channel-major (C, B, L) view: batch on the sublane axis ---------- #
    # Free (pure reshape) for the production config C_in == 1; one relayout
    # pass otherwise.
    x_t = x.reshape(1, B, L) if C_in == 1 else jnp.transpose(x, (1, 0, 2))

    # Flattened taps + bias, read as scalars from SMEM inside the kernel.
    params = jnp.concatenate(
        [weight.reshape(-1), bias.reshape(-1)]).astype(jnp.float32)

    kernel = functools.partial(_causal_conv1d_kernel, C_in, C_out, K, dilation, pad)

    y_t = pl.pallas_call(
        kernel,
        grid=(n_b, n_l),
        in_specs=[
            pl.BlockSpec((C_in, Bt, LT), lambda b, l: (0, b, l)),
            pl.BlockSpec(memory_space=pltpu.MemorySpace.SMEM),
        ],
        out_specs=pl.BlockSpec((C_out, Bt, LT), lambda b, l: (0, b, l)),
        out_shape=jax.ShapeDtypeStruct((C_out, B, L), x.dtype),
        scratch_shapes=[pltpu.VMEM((C_in, Bt, 128), x.dtype)],
        compiler_params=pltpu.CompilerParams(
            dimension_semantics=("parallel", "arbitrary")),
    )(x_t, params)

    return y_t.reshape(B, 1, L) if C_out == 1 else jnp.transpose(y_t, (1, 0, 2))


# ----------------------------- pure-JAX reference --------------------------- #

def _ref_causal_conv1d(x, weight, bias, dilation=1):
    K = weight.shape[-1]
    pad = (K - 1) * dilation
    y = lax.conv_general_dilated(
        x, weight, window_strides=(1,), padding=[(pad, 0)],
        rhs_dilation=(dilation,),
        dimension_numbers=("NCH", "OIH", "NCH"),
        precision=lax.Precision.HIGHEST)
    return y + bias[None, :, None]


# ----------------------------------- main ----------------------------------- #

if __name__ == "__main__":
    key = jax.random.PRNGKey(0)

    configs = [
        # Multi-channel, dilated, non-tile-aligned length; two length tiles so
        # the VMEM carry (causal left context) plus the ragged tail are exercised.
        dict(B=2, C_in=4, C_out=8, L=200, K=4, dilation=2, lane_tile=128),
        # The photovoltaic-model production config: CausalConv1D(1, 1, 4).
        dict(B=4, C_in=1, C_out=1, L=32, K=4, dilation=1, lane_tile=None),
        # Batch > 8: batch packed onto sublanes, ragged batch + length tails,
        # three length tiles of carry streaming.
        dict(B=12, C_in=1, C_out=1, L=300, K=3, dilation=1, lane_tile=128),
    ]

    for cfg in configs:
        key, kx, kw, kb = jax.random.split(key, 4)
        B, C_in, C_out, L, K, d = (cfg[k] for k in
                                   ("B", "C_in", "C_out", "L", "K", "dilation"))
        x = jax.random.normal(kx, (B, C_in, L), jnp.float32)
        bound = 1.0 / np.sqrt(C_in * K)
        w = jax.random.uniform(kw, (C_out, C_in, K), jnp.float32, -bound, bound)
        b = jax.random.uniform(kb, (C_out,), jnp.float32, -bound, bound)

        y = causal_conv1d(x, w, b, dilation=d, lane_tile=cfg["lane_tile"])
        jax.block_until_ready(y)

        y_ref = _ref_causal_conv1d(x, w, b, dilation=d)
        np.testing.assert_allclose(np.asarray(y), np.asarray(y_ref),
                                   rtol=1e-5, atol=1e-5)

    print("KERNEL_OK")
</pallas_src>

<mosaic_0001>
module attributes {stable_mosaic.version = 11 : i64} {
  func.func @_causal_conv1d_kernel(%arg0: i32, %arg1: i32, %arg2: memref<4x2x128xf32, #tpu.memory_space<vmem>>, %arg3: memref<136xf32, #tpu.memory_space<smem>>, %arg4: memref<8x2x128xf32, #tpu.memory_space<vmem>>, %arg5: memref<4x2x128xf32, #tpu.memory_space<vmem>>) attributes {dimension_semantics = [#tpu.dimension_semantics<parallel>, #tpu.dimension_semantics<arbitrary>], iteration_bounds = array<i64: 1, 2>, scalar_prefetch = 0 : i64, scratch_operands = 1 : i64, tpu.core_type = #tpu.core_type<tc>, window_params = [{transform_indices = @transform_0, window_bounds = array<i64: 4, 2, 128>}, {transform_indices = @transform_1, window_bounds = array<i64: 136>}, {transform_indices = @transform_2, window_bounds = array<i64: 8, 2, 128>}]} {
    %c0_i32 = arith.constant 0 : i32
    %0 = arith.cmpi eq, %arg1, %c0_i32 : i32
    %1 = arith.extui %0 : i1 to i32
    %c0_i32_0 = arith.constant 0 : i32
    %2 = arith.cmpi ne, %1, %c0_i32_0 : i32
    scf.if %2 {
      %cst_41 = arith.constant 0.000000e+00 : f32
      %603 = vector.broadcast %cst_41 : f32 to vector<4x2x128xf32>
      %c0_42 = arith.constant 0 : index
      %c0_43 = arith.constant 0 : index
      %c0_44 = arith.constant 0 : index
      %604 = vector.load %arg5[%c0_42, %c0_43, %c0_44] : memref<4x2x128xf32, #tpu.memory_space<vmem>>, vector<4x2x128xf32>
      tpu.vector_store %arg5[%c0_42, %c0_43, %c0_44], %603 {strides = array<i32>} : memref<4x2x128xf32, #tpu.memory_space<vmem>>, vector<4x2x128xf32>,
    } else {
    }
    %c0 = arith.constant 0 : index
    %c0_1 = arith.constant 0 : index
    %c0_2 = arith.constant 0 : index
    %3 = vector.load %arg2[%c0, %c0_1, %c0_2] : memref<4x2x128xf32, #tpu.memory_space<vmem>>, vector<4x2x128xf32>
    %c0_3 = arith.constant 0 : index
    %c0_4 = arith.constant 0 : index
    %c0_5 = arith.constant 0 : index
    %4 = vector.load %arg5[%c0_3, %c0_4, %c0_5] : memref<4x2x128xf32, #tpu.memory_space<vmem>>, vector<4x2x128xf32>
    %5 = tpu.concatenate %4, %3 in 2 : vector<4x2x128xf32>, vector<4x2x128xf32> -> vector<4x2x256xf32>
    %c0_6 = arith.constant 0 : index
    %c0_7 = arith.constant 0 : index
    %c0_8 = arith.constant 0 : index
    %6 = vector.load %arg5[%c0_6, %c0_7, %c0_8] : memref<4x2x128xf32, #tpu.memory_space<vmem>>, vector<4x2x128xf32>
    tpu.vector_store %arg5[%c0_6, %c0_7, %c0_8], %3 {strides = array<i32>} : memref<4x2x128xf32, #tpu.memory_space<vmem>>, vector<4x2x128xf32>,
    %7 = vector.extract_strided_slice %5 {offsets = [0, 0, 0], sizes = [1, 2, 256], strides = [1, 1, 1]} : vector<4x2x256xf32> to vector<1x2x256xf32>
    %8 = vector.shape_cast %7 : vector<1x2x256xf32> to vector<2x256xf32>
    %9 = vector.extract_strided_slice %8 {offsets = [0, 122], sizes = [2, 128], strides = [1, 1]} : vector<2x256xf32> to vector<2x128xf32>
    %10 = vector.extract_strided_slice %8 {offsets = [0, 124], sizes = [2, 128], strides = [1, 1]} : vector<2x256xf32> to vector<2x128xf32>
    %11 = vector.extract_strided_slice %8 {offsets = [0, 126], sizes = [2, 128], strides = [1, 1]} : vector<2x256xf32> to vector<2x128xf32>
    %12 = vector.extract_strided_slice %3 {offsets = [0, 0, 0], sizes = [1, 2, 128], strides = [1, 1, 1]} : vector<4x2x128xf32> to vector<1x2x128xf32>
    %13 = vector.shape_cast %12 : vector<1x2x128xf32> to vector<2x128xf32>
    %14 = vector.extract_strided_slice %5 {offsets = [1, 0, 0], sizes = [1, 2, 256], strides = [1, 1, 1]} : vector<4x2x256xf32> to vector<1x2x256xf32>
    %15 = vector.shape_cast %14 : vector<1x2x256xf32> to vector<2x256xf32>
    %16 = vector.extract_strided_slice %15 {offsets = [0, 122], sizes = [2, 128], strides = [1, 1]} : vector<2x256xf32> to vector<2x128xf32>
    %17 = vector.extract_strided_slice %15 {offsets = [0, 124], sizes = [2, 128], strides = [1, 1]} : vector<2x256xf32> to vector<2x128xf32>
    %18 = vector.extract_strided_slice %15 {offsets = [0, 126], sizes = [2, 128], strides = [1, 1]} : vector<2x256xf32> to vector<2x128xf32>
    %19 = vector.extract_strided_slice %3 {offsets = [1, 0, 0], sizes = [1, 2, 128], strides = [1, 1, 1]} : vector<4x2x128xf32> to vector<1x2x128xf32>
    %20 = vector.shape_cast %19 : vector<1x2x128xf32> to vector<2x128xf32>
    %21 = vector.extract_strided_slice %5 {offsets = [2, 0, 0], sizes = [1, 2, 256], strides = [1, 1, 1]} : vector<4x2x256xf32> to vector<1x2x256xf32>
    %22 = vector.shape_cast %21 : vector<1x2x256xf32> to vector<2x256xf32>
    %23 = vector.extract_strided_slice %22 {offsets = [0, 122], sizes = [2, 128], strides = [1, 1]} : vector<2x256xf32> to vector<2x128xf32>
    %24 = vector.extract_strided_slice %22 {offsets = [0, 124], sizes = [2, 128], strides = [1, 1]} : vector<2x256xf32> to vector<2x128xf32>
    %25 = vector.extract_strided_slice %22 {offsets = [0, 126], sizes = [2, 128], strides = [1, 1]} : vector<2x256xf32> to vector<2x128xf32>
    %26 = vector.extract_strided_slice %3 {offsets = [2, 0, 0], sizes = [1, 2, 128], strides = [1, 1, 1]} : vector<4x2x128xf32> to vector<1x2x128xf32>
    %27 = vector.shape_cast %26 : vector<1x2x128xf32> to vector<2x128xf32>
    %28 = vector.extract_strided_slice %5 {offsets = [3, 0, 0], sizes = [1, 2, 256], strides = [1, 1, 1]} : vector<4x2x256xf32> to vector<1x2x256xf32>
    %29 = vector.shape_cast %28 : vector<1x2x256xf32> to vector<2x256xf32>
    %30 = vector.extract_strided_slice %29 {offsets = [0, 122], sizes = [2, 128], strides = [1, 1]} : vector<2x256xf32> to vector<2x128xf32>
    %31 = vector.extract_strided_slice %29 {offsets = [0, 124], sizes = [2, 128], strides = [1, 1]} : vector<2x256xf32> to vector<2x128xf32>
    %32 = vector.extract_strided_slice %29 {offsets = [0, 126], sizes = [2, 128], strides = [1, 1]} : vector<2x256xf32> to vector<2x128xf32>
    %33 = vector.extract_strided_slice %3 {offsets = [3, 0, 0], sizes = [1, 2, 128], strides = [1, 1, 1]} : vector<4x2x128xf32> to vector<1x2x128xf32>
    %34 = vector.shape_cast %33 : vector<1x2x128xf32> to vector<2x128xf32>
    %cst = arith.constant 0.000000e+00 : f32
    %35 = vector.broadcast %cst : f32 to vector<2x128xf32>
    %c0_9 = arith.constant 0 : index
    %36 = memref.load %arg3[%c0_9] : memref<136xf32, #tpu.memory_space<smem>>
    %37 = vector.broadcast %36 : f32 to vector<2x128xf32>
    %38 = arith.mulf %37, %9 : vector<2x128xf32>
    %39 = arith.addf %35, %38 : vector<2x128xf32>
    %c1 = arith.constant 1 : index
    %40 = memref.load %arg3[%c1] : memref<136xf32, #tpu.memory_space<smem>>
    %41 = vector.broadcast %40 : f32 to vector<2x128xf32>
    %42 = arith.mulf %41, %10 : vector<2x128xf32>
    %43 = arith.addf %39, %42 : vector<2x128xf32>
    %c2 = arith.constant 2 : index
    %44 = memref.load %arg3[%c2] : memref<136xf32, #tpu.memory_space<smem>>
    %45 = vector.broadcast %44 : f32 to vector<2x128xf32>
    %46 = arith.mulf %45, %11 : vector<2x128xf32>
    %47 = arith.addf %43, %46 : vector<2x128xf32>
    %c3 = arith.constant 3 : index
    %48 = memref.load %arg3[%c3] : memref<136xf32, #tpu.memory_space<smem>>
    %49 = vector.broadcast %48 : f32 to vector<2x128xf32>
    %50 = arith.mulf %49, %13 : vector<2x128xf32>
    %51 = arith.addf %47, %50 : vector<2x128xf32>
    %c4 = arith.constant 4 : index
    %52 = memref.load %arg3[%c4] : memref<136xf32, #tpu.memory_space<smem>>
    %53 = vector.broadcast %52 : f32 to vector<2x128xf32>
    %54 = arith.mulf %53, %16 : vector<2x128xf32>
    %55 = arith.addf %51, %54 : vector<2x128xf32>
    %c5 = arith.constant 5 : index
    %56 = memref.load %arg3[%c5] : memref<136xf32, #tpu.memory_space<smem>>
    %57 = vector.broadcast %56 : f32 to vector<2x128xf32>
    %58 = arith.mulf %57, %17 : vector<2x128xf32>
    %59 = arith.addf %55, %58 : vector<2x128xf32>
    %c6 = arith.constant 6 : index
    %60 = memref.load %arg3[%c6] : memref<136xf32, #tpu.memory_space<smem>>
    %61 = vector.broadcast %60 : f32 to vector<2x128xf32>
    %62 = arith.mulf %61, %18 : vector<2x128xf32>
    %63 = arith.addf %59, %62 : vector<2x128xf32>
    %c7 = arith.constant 7 : index
    %64 = memref.load %arg3[%c7] : memref<136xf32, #tpu.memory_space<smem>>
    %65 = vector.broadcast %64 : f32 to vector<2x128xf32>
    %66 = arith.mulf %65, %20 : vector<2x128xf32>
    %67 = arith.addf %63, %66 : vector<2x128xf32>
    %c8 = arith.constant 8 : index
    %68 = memref.load %arg3[%c8] : memref<136xf32, #tpu.memory_space<smem>>
    %69 = vector.broadcast %68 : f32 to vector<2x128xf32>
    %70 = arith.mulf %69, %23 : vector<2x128xf32>
    %71 = arith.addf %67, %70 : vector<2x128xf32>
    %c9 = arith.constant 9 : index
    %72 = memref.load %arg3[%c9] : memref<136xf32, #tpu.memory_space<smem>>
    %73 = vector.broadcast %72 : f32 to vector<2x128xf32>
    %74 = arith.mulf %73, %24 : vector<2x128xf32>
    %75 = arith.addf %71, %74 : vector<2x128xf32>
    %c10 = arith.constant 10 : index
    %76 = memref.load %arg3[%c10] : memref<136xf32, #tpu.memory_space<smem>>
    %77 = vector.broadcast %76 : f32 to vector<2x128xf32>
    %78 = arith.mulf %77, %25 : vector<2x128xf32>
    %79 = arith.addf %75, %78 : vector<2x128xf32>
    %c11 = arith.constant 11 : index
    %80 = memref.load %arg3[%c11] : memref<136xf32, #tpu.memory_space<smem>>
    %81 = vector.broadcast %80 : f32 to vector<2x128xf32>
    %82 = arith.mulf %81, %27 : vector<2x128xf32>
    %83 = arith.addf %79, %82 : vector<2x128xf32>
    %c12 = arith.constant 12 : index
    %84 = memref.load %arg3[%c12] : memref<136xf32, #tpu.memory_space<smem>>
    %85 = vector.broadcast %84 : f32 to vector<2x128xf32>
    %86 = arith.mulf %85, %30 : vector<2x128xf32>
    %87 = arith.addf %83, %86 : vector<2x128xf32>
    %c13 = arith.constant 13 : index
    %88 = memref.load %arg3[%c13] : memref<136xf32, #tpu.memory_space<smem>>
    %89 = vector.broadcast %88 : f32 to vector<2x128xf32>
    %90 = arith.mulf %89, %31 : vector<2x128xf32>
    %91 = arith.addf %87, %90 : vector<2x128xf32>
    %c14 = arith.constant 14 : index
    %92 = memref.load %arg3[%c14] : memref<136xf32, #tpu.memory_space<smem>>
    %93 = vector.broadcast %92 : f32 to vector<2x128xf32>
    %94 = arith.mulf %93, %32 : vector<2x128xf32>
    %95 = arith.addf %91, %94 : vector<2x128xf32>
    %c15 = arith.constant 15 : index
    %96 = memref.load %arg3[%c15] : memref<136xf32, #tpu.memory_space<smem>>
    %97 = vector.broadcast %96 : f32 to vector<2x128xf32>
    %98 = arith.mulf %97, %34 : vector<2x128xf32>
    %99 = arith.addf %95, %98 : vector<2x128xf32>
    %c128 = arith.constant 128 : index
    %100 = memref.load %arg3[%c128] : memref<136xf32, #tpu.memory_space<smem>>
    %101 = vector.broadcast %100 : f32 to vector<2x128xf32>
    %102 = arith.addf %99, %101 : vector<2x128xf32>
    %c0_10 = arith.constant 0 : index
    %c0_11 = arith.constant 0 : index
    %c0_12 = arith.constant 0 : index
    %103 = vector.load %arg4[%c0_10, %c0_11, %c0_12] : memref<8x2x128xf32, #tpu.memory_space<vmem>>, vector<1x2x128xf32>
    %104 = vector.shape_cast %103 : vector<1x2x128xf32> to vector<2x128xf32>
    %105 = vector.shape_cast %102 : vector<2x128xf32> to vector<1x2x128xf32>
    tpu.vector_store %arg4[%c0_10, %c0_11, %c0_12], %105 {strides = array<i32>} : memref<8x2x128xf32, #tpu.memory_space<vmem>>, vector<1x2x128xf32>,
    %cst_13 = arith.constant 0.000000e+00 : f32
    %106 = vector.broadcast %cst_13 : f32 to vector<2x128xf32>
    %c16 = arith.constant 16 : index
    %107 = memref.load %arg3[%c16] : memref<136xf32, #tpu.memory_space<smem>>
    %108 = vector.broadcast %107 : f32 to vector<2x128xf32>
    %109 = arith.mulf %108, %9 : vector<2x128xf32>
    %110 = arith.addf %106, %109 : vector<2x128xf32>
    %c17 = arith.constant 17 : index
    %111 = memref.load %arg3[%c17] : memref<136xf32, #tpu.memory_space<smem>>
    %112 = vector.broadcast %111 : f32 to vector<2x128xf32>
    %113 = arith.mulf %112, %10 : vector<2x128xf32>
    %114 = arith.addf %110, %113 : vector<2x128xf32>
    %c18 = arith.constant 18 : index
    %115 = memref.load %arg3[%c18] : memref<136xf32, #tpu.memory_space<smem>>
    %116 = vector.broadcast %115 : f32 to vector<2x128xf32>
    %117 = arith.mulf %116, %11 : vector<2x128xf32>
    %118 = arith.addf %114, %117 : vector<2x128xf32>
    %c19 = arith.constant 19 : index
    %119 = memref.load %arg3[%c19] : memref<136xf32, #tpu.memory_space<smem>>
    %120 = vector.broadcast %119 : f32 to vector<2x128xf32>
    %121 = arith.mulf %120, %13 : vector<2x128xf32>
    %122 = arith.addf %118, %121 : vector<2x128xf32>
    %c20 = arith.constant 20 : index
    %123 = memref.load %arg3[%c20] : memref<136xf32, #tpu.memory_space<smem>>
    %124 = vector.broadcast %123 : f32 to vector<2x128xf32>
    %125 = arith.mulf %124, %16 : vector<2x128xf32>
    %126 = arith.addf %122, %125 : vector<2x128xf32>
    %c21 = arith.constant 21 : index
    %127 = memref.load %arg3[%c21] : memref<136xf32, #tpu.memory_space<smem>>
    %128 = vector.broadcast %127 : f32 to vector<2x128xf32>
    %129 = arith.mulf %128, %17 : vector<2x128xf32>
    %130 = arith.addf %126, %129 : vector<2x128xf32>
    %c22 = arith.constant 22 : index
    %131 = memref.load %arg3[%c22] : memref<136xf32, #tpu.memory_space<smem>>
    %132 = vector.broadcast %131 : f32 to vector<2x128xf32>
    %133 = arith.mulf %132, %18 : vector<2x128xf32>
    %134 = arith.addf %130, %133 : vector<2x128xf32>
    %c23 = arith.constant 23 : index
    %135 = memref.load %arg3[%c23] : memref<136xf32, #tpu.memory_space<smem>>
    %136 = vector.broadcast %135 : f32 to vector<2x128xf32>
    %137 = arith.mulf %136, %20 : vector<2x128xf32>
    %138 = arith.addf %134, %137 : vector<2x128xf32>
    %c24 = arith.constant 24 : index
    %139 = memref.load %arg3[%c24] : memref<136xf32, #tpu.memory_space<smem>>
    %140 = vector.broadcast %139 : f32 to vector<2x128xf32>
    %141 = arith.mulf %140, %23 : vector<2x128xf32>
    %142 = arith.addf %138, %141 : vector<2x128xf32>
    %c25 = arith.constant 25 : index
    %143 = memref.load %arg3[%c25] : memref<136xf32, #tpu.memory_space<smem>>
    %144 = vector.broadcast %143 : f32 to vector<2x128xf32>
    %145 = arith.mulf %144, %24 : vector<2x128xf32>
    %146 = arith.addf %142, %145 : vector<2x128xf32>
    %c26 = arith.constant 26 : index
    %147 = memref.load %arg3[%c26] : memref<136xf32, #tpu.memory_space<smem>>
    %148 = vector.broadcast %147 : f32 to vector<2x128xf32>
    %149 = arith.mulf %148, %25 : vector<2x128xf32>
    %150 = arith.addf %146, %149 : vector<2x128xf32>
    %c27 = arith.constant 27 : index
    %151 = memref.load %arg3[%c27] : memref<136xf32, #tpu.memory_space<smem>>
    %152 = vector.broadcast %151 : f32 to vector<2x128xf32>
    %153 = arith.mulf %152, %27 : vector<2x128xf32>
    %154 = arith.addf %150, %153 : vector<2x128xf32>
    %c28 = arith.constant 28 : index
    %155 = memref.load %arg3[%c28] : memref<136xf32, #tpu.memory_space<smem>>
    %156 = vector.broadcast %155 : f32 to vector<2x128xf32>
    %157 = arith.mulf %156, %30 : vector<2x128xf32>
    %158 = arith.addf %154, %157 : vector<2x128xf32>
    %c29 = arith.constant 29 : index
    %159 = memref.load %arg3[%c29] : memref<136xf32, #tpu.memory_space<smem>>
    %160 = vector.broadcast %159 : f32 to vector<2x128xf32>
    %161 = arith.mulf %160, %31 : vector<2x128xf32>
    %162 = arith.addf %158, %161 : vector<2x128xf32>
    %c30 = arith.constant 30 : index
    %163 = memref.load %arg3[%c30] : memref<136xf32, #tpu.memory_space<smem>>
    %164 = vector.broadcast %163 : f32 to vector<2x128xf32>
    %165 = arith.mulf %164, %32 : vector<2x128xf32>
    %166 = arith.addf %162, %165 : vector<2x128xf32>
    %c31 = arith.constant 31 : index
    %167 = memref.load %arg3[%c31] : memref<136xf32, #tpu.memory_space<smem>>
    %168 = vector.broadcast %167 : f32 to vector<2x128xf32>
    %169 = arith.mulf %168, %34 : vector<2x128xf32>
    %170 = arith.addf %166, %169 : vector<2x128xf32>
    %c129 = arith.constant 129 : index
    %171 = memref.load %arg3[%c129] : memref<136xf32, #tpu.memory_space<smem>>
    %172 = vector.broadcast %171 : f32 to vector<2x128xf32>
    %173 = arith.addf %170, %172 : vector<2x128xf32>
    %c1_14 = arith.constant 1 : index
    %c0_15 = arith.constant 0 : index
    %c0_16 = arith.constant 0 : index
    %174 = vector.load %arg4[%c1_14, %c0_15, %c0_16] : memref<8x2x128xf32, #tpu.memory_space<vmem>>, vector<1x2x128xf32>
    %175 = vector.shape_cast %174 : vector<1x2x128xf32> to vector<2x128xf32>
    %176 = vector.shape_cast %173 : vector<2x128xf32> to vector<1x2x128xf32>
    tpu.vector_store %arg4[%c1_14, %c0_15, %c0_16], %176 {strides = array<i32>} : memref<8x2x128xf32, #tpu.memory_space<vmem>>, vector<1x2x128xf32>,
    %cst_17 = arith.constant 0.000000e+00 : f32
    %177 = vector.broadcast %cst_17 : f32 to vector<2x128xf32>
    %c32 = arith.constant 32 : index
    %178 = memref.load %arg3[%c32] : memref<136xf32, #tpu.memory_space<smem>>
    %179 = vector.broadcast %178 : f32 to vector<2x128xf32>
    %180 = arith.mulf %179, %9 : vector<2x128xf32>
    %181 = arith.addf %177, %180 : vector<2x128xf32>
    %c33 = arith.constant 33 : index
    %182 = memref.load %arg3[%c33] : memref<136xf32, #tpu.memory_space<smem>>
    %183 = vector.broadcast %182 : f32 to vector<2x128xf32>
    %184 = arith.mulf %183, %10 : vector<2x128xf32>
    %185 = arith.addf %181, %184 : vector<2x128xf32>
    %c34 = arith.constant 34 : index
    %186 = memref.load %arg3[%c34] : memref<136xf32, #tpu.memory_space<smem>>
    %187 = vector.broadcast %186 : f32 to vector<2x128xf32>
    %188 = arith.mulf %187, %11 : vector<2x128xf32>
    %189 = arith.addf %185, %188 : vector<2x128xf32>
    %c35 = arith.constant 35 : index
    %190 = memref.load %arg3[%c35] : memref<136xf32, #tpu.memory_space<smem>>
    %191 = vector.broadcast %190 : f32 to vector<2x128xf32>
    %192 = arith.mulf %191, %13 : vector<2x128xf32>
    %193 = arith.addf %189, %192 : vector<2x128xf32>
    %c36 = arith.constant 36 : index
    %194 = memref.load %arg3[%c36] : memref<136xf32, #tpu.memory_space<smem>>
    %195 = vector.broadcast %194 : f32 to vector<2x128xf32>
    %196 = arith.mulf %195, %16 : vector<2x128xf32>
    %197 = arith.addf %193, %196 : vector<2x128xf32>
    %c37 = arith.constant 37 : index
    %198 = memref.load %arg3[%c37] : memref<136xf32, #tpu.memory_space<smem>>
    %199 = vector.broadcast %198 : f32 to vector<2x128xf32>
    %200 = arith.mulf %199, %17 : vector<2x128xf32>
    %201 = arith.addf %197, %200 : vector<2x128xf32>
    %c38 = arith.constant 38 : index
    %202 = memref.load %arg3[%c38] : memref<136xf32, #tpu.memory_space<smem>>
    %203 = vector.broadcast %202 : f32 to vector<2x128xf32>
    %204 = arith.mulf %203, %18 : vector<2x128xf32>
    %205 = arith.addf %201, %204 : vector<2x128xf32>
    %c39 = arith.constant 39 : index
    %206 = memref.load %arg3[%c39] : memref<136xf32, #tpu.memory_space<smem>>
    %207 = vector.broadcast %206 : f32 to vector<2x128xf32>
    %208 = arith.mulf %207, %20 : vector<2x128xf32>
    %209 = arith.addf %205, %208 : vector<2x128xf32>
    %c40 = arith.constant 40 : index
    %210 = memref.load %arg3[%c40] : memref<136xf32, #tpu.memory_space<smem>>
    %211 = vector.broadcast %210 : f32 to vector<2x128xf32>
    %212 = arith.mulf %211, %23 : vector<2x128xf32>
    %213 = arith.addf %209, %212 : vector<2x128xf32>
    %c41 = arith.constant 41 : index
    %214 = memref.load %arg3[%c41] : memref<136xf32, #tpu.memory_space<smem>>
    %215 = vector.broadcast %214 : f32 to vector<2x128xf32>
    %216 = arith.mulf %215, %24 : vector<2x128xf32>
    %217 = arith.addf %213, %216 : vector<2x128xf32>
    %c42 = arith.constant 42 : index
    %218 = memref.load %arg3[%c42] : memref<136xf32, #tpu.memory_space<smem>>
    %219 = vector.broadcast %218 : f32 to vector<2x128xf32>
    %220 = arith.mulf %219, %25 : vector<2x128xf32>
    %221 = arith.addf %217, %220 : vector<2x128xf32>
    %c43 = arith.constant 43 : index
    %222 = memref.load %arg3[%c43] : memref<136xf32, #tpu.memory_space<smem>>
    %223 = vector.broadcast %222 : f32 to vector<2x128xf32>
    %224 = arith.mulf %223, %27 : vector<2x128xf32>
    %225 = arith.addf %221, %224 : vector<2x128xf32>
    %c44 = arith.constant 44 : index
    %226 = memref.load %arg3[%c44] : memref<136xf32, #tpu.memory_space<smem>>
    %227 = vector.broadcast %226 : f32 to vector<2x128xf32>
    %228 = arith.mulf %227, %30 : vector<2x128xf32>
    %229 = arith.addf %225, %228 : vector<2x128xf32>
    %c45 = arith.constant 45 : index
    %230 = memref.load %arg3[%c45] : memref<136xf32, #tpu.memory_space<smem>>
    %231 = vector.broadcast %230 : f32 to vector<2x128xf32>
    %232 = arith.mulf %231, %31 : vector<2x128xf32>
    %233 = arith.addf %229, %232 : vector<2x128xf32>
    %c46 = arith.constant 46 : index
    %234 = memref.load %arg3[%c46] : memref<136xf32, #tpu.memory_space<smem>>
    %235 = vector.broadcast %234 : f32 to vector<2x128xf32>
    %236 = arith.mulf %235, %32 : vector<2x128xf32>
    %237 = arith.addf %233, %236 : vector<2x128xf32>
    %c47 = arith.constant 47 : index
    %238 = memref.load %arg3[%c47] : memref<136xf32, #tpu.memory_space<smem>>
    %239 = vector.broadcast %238 : f32 to vector<2x128xf32>
    %240 = arith.mulf %239, %34 : vector<2x128xf32>
    %241 = arith.addf %237, %240 : vector<2x128xf32>
    %c130 = arith.constant 130 : index
    %242 = memref.load %arg3[%c130] : memref<136xf32, #tpu.memory_space<smem>>
    %243 = vector.broadcast %242 : f32 to vector<2x128xf32>
    %244 = arith.addf %241, %243 : vector<2x128xf32>
    %c2_18 = arith.constant 2 : index
    %c0_19 = arith.constant 0 : index
    %c0_20 = arith.constant 0 : index
    %245 = vector.load %arg4[%c2_18, %c0_19, %c0_20] : memref<8x2x128xf32, #tpu.memory_space<vmem>>, vector<1x2x128xf32>
    %246 = vector.shape_cast %245 : vector<1x2x128xf32> to vector<2x128xf32>
    %247 = vector.shape_cast %244 : vector<2x128xf32> to vector<1x2x128xf32>
    tpu.vector_store %arg4[%c2_18, %c0_19, %c0_20], %247 {strides = array<i32>} : memref<8x2x128xf32, #tpu.memory_space<vmem>>, vector<1x2x128xf32>,
    %cst_21 = arith.constant 0.000000e+00 : f32
    %248 = vector.broadcast %cst_21 : f32 to vector<2x128xf32>
    %c48 = arith.constant 48 : index
    %249 = memref.load %arg3[%c48] : memref<136xf32, #tpu.memory_space<smem>>
    %250 = vector.broadcast %249 : f32 to vector<2x128xf32>
    %251 = arith.mulf %250, %9 : vector<2x128xf32>
    %252 = arith.addf %248, %251 : vector<2x128xf32>
    %c49 = arith.constant 49 : index
    %253 = memref.load %arg3[%c49] : memref<136xf32, #tpu.memory_space<smem>>
    %254 = vector.broadcast %253 : f32 to vector<2x128xf32>
    %255 = arith.mulf %254, %10 : vector<2x128xf32>
    %256 = arith.addf %252, %255 : vector<2x128xf32>
    %c50 = arith.constant 50 : index
    %257 = memref.load %arg3[%c50] : memref<136xf32, #tpu.memory_space<smem>>
    %258 = vector.broadcast %257 : f32 to vector<2x128xf32>
    %259 = arith.mulf %258, %11 : vector<2x128xf32>
    %260 = arith.addf %256, %259 : vector<2x128xf32>
    %c51 = arith.constant 51 : index
    %261 = memref.load %arg3[%c51] : memref<136xf32, #tpu.memory_space<smem>>
    %262 = vector.broadcast %261 : f32 to vector<2x128xf32>
    %263 = arith.mulf %262, %13 : vector<2x128xf32>
    %264 = arith.addf %260, %263 : vector<2x128xf32>
    %c52 = arith.constant 52 : index
    %265 = memref.load %arg3[%c52] : memref<136xf32, #tpu.memory_space<smem>>
    %266 = vector.broadcast %265 : f32 to vector<2x128xf32>
    %267 = arith.mulf %266, %16 : vector<2x128xf32>
    %268 = arith.addf %264, %267 : vector<2x128xf32>
    %c53 = arith.constant 53 : index
    %269 = memref.load %arg3[%c53] : memref<136xf32, #tpu.memory_space<smem>>
    %270 = vector.broadcast %269 : f32 to vector<2x128xf32>
    %271 = arith.mulf %270, %17 : vector<2x128xf32>
    %272 = arith.addf %268, %271 : vector<2x128xf32>
    %c54 = arith.constant 54 : index
    %273 = memref.load %arg3[%c54] : memref<136xf32, #tpu.memory_space<smem>>
    %274 = vector.broadcast %273 : f32 to vector<2x128xf32>
    %275 = arith.mulf %274, %18 : vector<2x128xf32>
    %276 = arith.addf %272, %275 : vector<2x128xf32>
    %c55 = arith.constant 55 : index
    %277 = memref.load %arg3[%c55] : memref<136xf32, #tpu.memory_space<smem>>
    %278 = vector.broadcast %277 : f32 to vector<2x128xf32>
    %279 = arith.mulf %278, %20 : vector<2x128xf32>
    %280 = arith.addf %276, %279 : vector<2x128xf32>
    %c56 = arith.constant 56 : index
    %281 = memref.load %arg3[%c56] : memref<136xf32, #tpu.memory_space<smem>>
    %282 = vector.broadcast %281 : f32 to vector<2x128xf32>
    %283 = arith.mulf %282, %23 : vector<2x128xf32>
    %284 = arith.addf %280, %283 : vector<2x128xf32>
    %c57 = arith.constant 57 : index
    %285 = memref.load %arg3[%c57] : memref<136xf32, #tpu.memory_space<smem>>
    %286 = vector.broadcast %285 : f32 to vector<2x128xf32>
    %287 = arith.mulf %286, %24 : vector<2x128xf32>
    %288 = arith.addf %284, %287 : vector<2x128xf32>
    %c58 = arith.constant 58 : index
    %289 = memref.load %arg3[%c58] : memref<136xf32, #tpu.memory_space<smem>>
    %290 = vector.broadcast %289 : f32 to vector<2x128xf32>
    %291 = arith.mulf %290, %25 : vector<2x128xf32>
    %292 = arith.addf %288, %291 : vector<2x128xf32>
    %c59 = arith.constant 59 : index
    %293 = memref.load %arg3[%c59] : memref<136xf32, #tpu.memory_space<smem>>
    %294 = vector.broadcast %293 : f32 to vector<2x128xf32>
    %295 = arith.mulf %294, %27 : vector<2x128xf32>
    %296 = arith.addf %292, %295 : vector<2x128xf32>
    %c60 = arith.constant 60 : index
    %297 = memref.load %arg3[%c60] : memref<136xf32, #tpu.memory_space<smem>>
    %298 = vector.broadcast %297 : f32 to vector<2x128xf32>
    %299 = arith.mulf %298, %30 : vector<2x128xf32>
    %300 = arith.addf %296, %299 : vector<2x128xf32>
    %c61 = arith.constant 61 : index
    %301 = memref.load %arg3[%c61] : memref<136xf32, #tpu.memory_space<smem>>
    %302 = vector.broadcast %301 : f32 to vector<2x128xf32>
    %303 = arith.mulf %302, %31 : vector<2x128xf32>
    %304 = arith.addf %300, %303 : vector<2x128xf32>
    %c62 = arith.constant 62 : index
    %305 = memref.load %arg3[%c62] : memref<136xf32, #tpu.memory_space<smem>>
    %306 = vector.broadcast %305 : f32 to vector<2x128xf32>
    %307 = arith.mulf %306, %32 : vector<2x128xf32>
    %308 = arith.addf %304, %307 : vector<2x128xf32>
    %c63 = arith.constant 63 : index
    %309 = memref.load %arg3[%c63] : memref<136xf32, #tpu.memory_space<smem>>
    %310 = vector.broadcast %309 : f32 to vector<2x128xf32>
    %311 = arith.mulf %310, %34 : vector<2x128xf32>
    %312 = arith.addf %308, %311 : vector<2x128xf32>
    %c131 = arith.constant 131 : index
    %313 = memref.load %arg3[%c131] : memref<136xf32, #tpu.memory_space<smem>>
    %314 = vector.broadcast %313 : f32 to vector<2x128xf32>
    %315 = arith.addf %312, %314 : vector<2x128xf32>
    %c3_22 = arith.constant 3 : index
    %c0_23 = arith.constant 0 : index
    %c0_24 = arith.constant 0 : index
    %316 = vector.load %arg4[%c3_22, %c0_23, %c0_24] : memref<8x2x128xf32, #tpu.memory_space<vmem>>, vector<1x2x128xf32>
    %317 = vector.shape_cast %316 : vector<1x2x128xf32> to vector<2x128xf32>
    %318 = vector.shape_cast %315 : vector<2x128xf32> to vector<1x2x128xf32>
    tpu.vector_store %arg4[%c3_22, %c0_23, %c0_24], %318 {strides = array<i32>} : memref<8x2x128xf32, #tpu.memory_space<vmem>>, vector<1x2x128xf32>,
    %cst_25 = arith.constant 0.000000e+00 : f32
    %319 = vector.broadcast %cst_25 : f32 to vector<2x128xf32>
    %c64 = arith.constant 64 : index
    %320 = memref.load %arg3[%c64] : memref<136xf32, #tpu.memory_space<smem>>
    %321 = vector.broadcast %320 : f32 to vector<2x128xf32>
    %322 = arith.mulf %321, %9 : vector<2x128xf32>
    %323 = arith.addf %319, %322 : vector<2x128xf32>
    %c65 = arith.constant 65 : index
    %324 = memref.load %arg3[%c65] : memref<136xf32, #tpu.memory_space<smem>>
    %325 = vector.broadcast %324 : f32 to vector<2x128xf32>
    %326 = arith.mulf %325, %10 : vector<2x128xf32>
    %327 = arith.addf %323, %326 : vector<2x128xf32>
    %c66 = arith.constant 66 : index
    %328 = memref.load %arg3[%c66] : memref<136xf32, #tpu.memory_space<smem>>
    %329 = vector.broadcast %328 : f32 to vector<2x128xf32>
    %330 = arith.mulf %329, %11 : vector<2x128xf32>
    %331 = arith.addf %327, %330 : vector<2x128xf32>
    %c67 = arith.constant 67 : index
    %332 = memref.load %arg3[%c67] : memref<136xf32, #tpu.memory_space<smem>>
    %333 = vector.broadcast %332 : f32 to vector<2x128xf32>
    %334 = arith.mulf %333, %13 : vector<2x128xf32>
    %335 = arith.addf %331, %334 : vector<2x128xf32>
    %c68 = arith.constant 68 : index
    %336 = memref.load %arg3[%c68] : memref<136xf32, #tpu.memory_space<smem>>
    %337 = vector.broadcast %336 : f32 to vector<2x128xf32>
    %338 = arith.mulf %337, %16 : vector<2x128xf32>
    %339 = arith.addf %335, %338 : vector<2x128xf32>
    %c69 = arith.constant 69 : index
    %340 = memref.load %arg3[%c69] : memref<136xf32, #tpu.memory_space<smem>>
    %341 = vector.broadcast %340 : f32 to vector<2x128xf32>
    %342 = arith.mulf %341, %17 : vector<2x128xf32>
    %343 = arith.addf %339, %342 : vector<2x128xf32>
    %c70 = arith.constant 70 : index
    %344 = memref.load %arg3[%c70] : memref<136xf32, #tpu.memory_space<smem>>
    %345 = vector.broadcast %344 : f32 to vector<2x128xf32>
    %346 = arith.mulf %345, %18 : vector<2x128xf32>
    %347 = arith.addf %343, %346 : vector<2x128xf32>
    %c71 = arith.constant 71 : index
    %348 = memref.load %arg3[%c71] : memref<136xf32, #tpu.memory_space<smem>>
    %349 = vector.broadcast %348 : f32 to vector<2x128xf32>
    %350 = arith.mulf %349, %20 : vector<2x128xf32>
    %351 = arith.addf %347, %350 : vector<2x128xf32>
    %c72 = arith.constant 72 : index
    %352 = memref.load %arg3[%c72] : memref<136xf32, #tpu.memory_space<smem>>
    %353 = vector.broadcast %352 : f32 to vector<2x128xf32>
    %354 = arith.mulf %353, %23 : vector<2x128xf32>
    %355 = arith.addf %351, %354 : vector<2x128xf32>
    %c73 = arith.constant 73 : index
    %356 = memref.load %arg3[%c73] : memref<136xf32, #tpu.memory_space<smem>>
    %357 = vector.broadcast %356 : f32 to vector<2x128xf32>
    %358 = arith.mulf %357, %24 : vector<2x128xf32>
    %359 = arith.addf %355, %358 : vector<2x128xf32>
    %c74 = arith.constant 74 : index
    %360 = memref.load %arg3[%c74] : memref<136xf32, #tpu.memory_space<smem>>
    %361 = vector.broadcast %360 : f32 to vector<2x128xf32>
    %362 = arith.mulf %361, %25 : vector<2x128xf32>
    %363 = arith.addf %359, %362 : vector<2x128xf32>
    %c75 = arith.constant 75 : index
    %364 = memref.load %arg3[%c75] : memref<136xf32, #tpu.memory_space<smem>>
    %365 = vector.broadcast %364 : f32 to vector<2x128xf32>
    %366 = arith.mulf %365, %27 : vector<2x128xf32>
    %367 = arith.addf %363, %366 : vector<2x128xf32>
    %c76 = arith.constant 76 : index
    %368 = memref.load %arg3[%c76] : memref<136xf32, #tpu.memory_space<smem>>
    %369 = vector.broadcast %368 : f32 to vector<2x128xf32>
    %370 = arith.mulf %369, %30 : vector<2x128xf32>
    %371 = arith.addf %367, %370 : vector<2x128xf32>
    %c77 = arith.constant 77 : index
    %372 = memref.load %arg3[%c77] : memref<136xf32, #tpu.memory_space<smem>>
    %373 = vector.broadcast %372 : f32 to vector<2x128xf32>
    %374 = arith.mulf %373, %31 : vector<2x128xf32>
    %375 = arith.addf %371, %374 : vector<2x128xf32>
    %c78 = arith.constant 78 : index
    %376 = memref.load %arg3[%c78] : memref<136xf32, #tpu.memory_space<smem>>
    %377 = vector.broadcast %376 : f32 to vector<2x128xf32>
    %378 = arith.mulf %377, %32 : vector<2x128xf32>
    %379 = arith.addf %375, %378 : vector<2x128xf32>
    %c79 = arith.constant 79 : index
    %380 = memref.load %arg3[%c79] : memref<136xf32, #tpu.memory_space<smem>>
    %381 = vector.broadcast %380 : f32 to vector<2x128xf32>
    %382 = arith.mulf %381, %34 : vector<2x128xf32>
    %383 = arith.addf %379, %382 : vector<2x128xf32>
    %c132 = arith.constant 132 : index
    %384 = memref.load %arg3[%c132] : memref<136xf32, #tpu.memory_space<smem>>
    %385 = vector.broadcast %384 : f32 to vector<2x128xf32>
    %386 = arith.addf %383, %385 : vector<2x128xf32>
    %c4_26 = arith.constant 4 : index
    %c0_27 = arith.constant 0 : index
    %c0_28 = arith.constant 0 : index
    %387 = vector.load %arg4[%c4_26, %c0_27, %c0_28] : memref<8x2x128xf32, #tpu.memory_space<vmem>>, vector<1x2x128xf32>
    %388 = vector.shape_cast %387 : vector<1x2x128xf32> to vector<2x128xf32>
    %389 = vector.shape_cast %386 : vector<2x128xf32> to vector<1x2x128xf32>
    tpu.vector_store %arg4[%c4_26, %c0_27, %c0_28], %389 {strides = array<i32>} : memref<8x2x128xf32, #tpu.memory_space<vmem>>, vector<1x2x128xf32>,
    %cst_29 = arith.constant 0.000000e+00 : f32
    %390 = vector.broadcast %cst_29 : f32 to vector<2x128xf32>
    %c80 = arith.constant 80 : index
    %391 = memref.load %arg3[%c80] : memref<136xf32, #tpu.memory_space<smem>>
    %392 = vector.broadcast %391 : f32 to vector<2x128xf32>
    %393 = arith.mulf %392, %9 : vector<2x128xf32>
    %394 = arith.addf %390, %393 : vector<2x128xf32>
    %c81 = arith.constant 81 : index
    %395 = memref.load %arg3[%c81] : memref<136xf32, #tpu.memory_space<smem>>
    %396 = vector.broadcast %395 : f32 to vector<2x128xf32>
    %397 = arith.mulf %396, %10 : vector<2x128xf32>
    %398 = arith.addf %394, %397 : vector<2x128xf32>
    %c82 = arith.constant 82 : index
    %399 = memref.load %arg3[%c82] : memref<136xf32, #tpu.memory_space<smem>>
    %400 = vector.broadcast %399 : f32 to vector<2x128xf32>
    %401 = arith.mulf %400, %11 : vector<2x128xf32>
    %402 = arith.addf %398, %401 : vector<2x128xf32>
    %c83 = arith.constant 83 : index
    %403 = memref.load %arg3[%c83] : memref<136xf32, #tpu.memory_space<smem>>
    %404 = vector.broadcast %403 : f32 to vector<2x128xf32>
    %405 = arith.mulf %404, %13 : vector<2x128xf32>
    %406 = arith.addf %402, %405 : vector<2x128xf32>
    %c84 = arith.constant 84 : index
    %407 = memref.load %arg3[%c84] : memref<136xf32, #tpu.memory_space<smem>>
    %408 = vector.broadcast %407 : f32 to vector<2x128xf32>
    %409 = arith.mulf %408, %16 : vector<2x128xf32>
    %410 = arith.addf %406, %409 : vector<2x128xf32>
    %c85 = arith.constant 85 : index
    %411 = memref.load %arg3[%c85] : memref<136xf32, #tpu.memory_space<smem>>
    %412 = vector.broadcast %411 : f32 to vector<2x128xf32>
    %413 = arith.mulf %412, %17 : vector<2x128xf32>
    %414 = arith.addf %410, %413 : vector<2x128xf32>
    %c86 = arith.constant 86 : index
    %415 = memref.load %arg3[%c86] : memref<136xf32, #tpu.memory_space<smem>>
    %416 = vector.broadcast %415 : f32 to vector<2x128xf32>
    %417 = arith.mulf %416, %18 : vector<2x128xf32>
    %418 = arith.addf %414, %417 : vector<2x128xf32>
    %c87 = arith.constant 87 : index
    %419 = memref.load %arg3[%c87] : memref<136xf32, #tpu.memory_space<smem>>
    %420 = vector.broadcast %419 : f32 to vector<2x128xf32>
    %421 = arith.mulf %420, %20 : vector<2x128xf32>
    %422 = arith.addf %418, %421 : vector<2x128xf32>
    %c88 = arith.constant 88 : index
    %423 = memref.load %arg3[%c88] : memref<136xf32, #tpu.memory_space<smem>>
    %424 = vector.broadcast %423 : f32 to vector<2x128xf32>
    %425 = arith.mulf %424, %23 : vector<2x128xf32>
    %426 = arith.addf %422, %425 : vector<2x128xf32>
    %c89 = arith.constant 89 : index
    %427 = memref.load %arg3[%c89] : memref<136xf32, #tpu.memory_space<smem>>
    %428 = vector.broadcast %427 : f32 to vector<2x128xf32>
    %429 = arith.mulf %428, %24 : vector<2x128xf32>
    %430 = arith.addf %426, %429 : vector<2x128xf32>
    %c90 = arith.constant 90 : index
    %431 = memref.load %arg3[%c90] : memref<136xf32, #tpu.memory_space<smem>>
    %432 = vector.broadcast %431 : f32 to vector<2x128xf32>
    %433 = arith.mulf %432, %25 : vector<2x128xf32>
    %434 = arith.addf %430, %433 : vector<2x128xf32>
    %c91 = arith.constant 91 : index
    %435 = memref.load %arg3[%c91] : memref<136xf32, #tpu.memory_space<smem>>
    %436 = vector.broadcast %435 : f32 to vector<2x128xf32>
    %437 = arith.mulf %436, %27 : vector<2x128xf32>
    %438 = arith.addf %434, %437 : vector<2x128xf32>
    %c92 = arith.constant 92 : index
    %439 = memref.load %arg3[%c92] : memref<136xf32, #tpu.memory_space<smem>>
    %440 = vector.broadcast %439 : f32 to vector<2x128xf32>
    %441 = arith.mulf %440, %30 : vector<2x128xf32>
    %442 = arith.addf %438, %441 : vector<2x128xf32>
    %c93 = arith.constant 93 : index
    %443 = memref.load %arg3[%c93] : memref<136xf32, #tpu.memory_space<smem>>
    %444 = vector.broadcast %443 : f32 to vector<2x128xf32>
    %445 = arith.mulf %444, %31 : vector<2x128xf32>
    %446 = arith.addf %442, %445 : vector<2x128xf32>
    %c94 = arith.constant 94 : index
    %447 = memref.load %arg3[%c94] : memref<136xf32, #tpu.memory_space<smem>>
    %448 = vector.broadcast %447 : f32 to vector<2x128xf32>
    %449 = arith.mulf %448, %32 : vector<2x128xf32>
    %450 = arith.addf %446, %449 : vector<2x128xf32>
    %c95 = arith.constant 95 : index
    %451 = memref.load %arg3[%c95] : memref<136xf32, #tpu.memory_space<smem>>
    %452 = vector.broadcast %451 : f32 to vector<2x128xf32>
    %453 = arith.mulf %452, %34 : vector<2x128xf32>
    %454 = arith.addf %450, %453 : vector<2x128xf32>
    %c133 = arith.constant 133 : index
    %455 = memref.load %arg3[%c133] : memref<136xf32, #tpu.memory_space<smem>>
    %456 = vector.broadcast %455 : f32 to vector<2x128xf32>
    %457 = arith.addf %454, %456 : vector<2x128xf32>
    %c5_30 = arith.constant 5 : index
    %c0_31 = arith.constant 0 : index
    %c0_32 = arith.constant 0 : index
    %458 = vector.load %arg4[%c5_30, %c0_31, %c0_32] : memref<8x2x128xf32, #tpu.memory_space<vmem>>, vector<1x2x128xf32>
    %459 = vector.shape_cast %458 : vector<1x2x128xf32> to vector<2x128xf32>
    %460 = vector.shape_cast %457 : vector<2x128xf32> to vector<1x2x128xf32>
    tpu.vector_store %arg4[%c5_30, %c0_31, %c0_32], %460 {strides = array<i32>} : memref<8x2x128xf32, #tpu.memory_space<vmem>>, vector<1x2x128xf32>,
    %cst_33 = arith.constant 0.000000e+00 : f32
    %461 = vector.broadcast %cst_33 : f32 to vector<2x128xf32>
    %c96 = arith.constant 96 : index
    %462 = memref.load %arg3[%c96] : memref<136xf32, #tpu.memory_space<smem>>
    %463 = vector.broadcast %462 : f32 to vector<2x128xf32>
    %464 = arith.mulf %463, %9 : vector<2x128xf32>
    %465 = arith.addf %461, %464 : vector<2x128xf32>
    %c97 = arith.constant 97 : index
    %466 = memref.load %arg3[%c97] : memref<136xf32, #tpu.memory_space<smem>>
    %467 = vector.broadcast %466 : f32 to vector<2x128xf32>
    %468 = arith.mulf %467, %10 : vector<2x128xf32>
    %469 = arith.addf %465, %468 : vector<2x128xf32>
    %c98 = arith.constant 98 : index
    %470 = memref.load %arg3[%c98] : memref<136xf32, #tpu.memory_space<smem>>
    %471 = vector.broadcast %470 : f32 to vector<2x128xf32>
    %472 = arith.mulf %471, %11 : vector<2x128xf32>
    %473 = arith.addf %469, %472 : vector<2x128xf32>
    %c99 = arith.constant 99 : index
    %474 = memref.load %arg3[%c99] : memref<136xf32, #tpu.memory_space<smem>>
    %475 = vector.broadcast %474 : f32 to vector<2x128xf32>
    %476 = arith.mulf %475, %13 : vector<2x128xf32>
    %477 = arith.addf %473, %476 : vector<2x128xf32>
    %c100 = arith.constant 100 : index
    %478 = memref.load %arg3[%c100] : memref<136xf32, #tpu.memory_space<smem>>
    %479 = vector.broadcast %478 : f32 to vector<2x128xf32>
    %480 = arith.mulf %479, %16 : vector<2x128xf32>
    %481 = arith.addf %477, %480 : vector<2x128xf32>
    %c101 = arith.constant 101 : index
    %482 = memref.load %arg3[%c101] : memref<136xf32, #tpu.memory_space<smem>>
    %483 = vector.broadcast %482 : f32 to vector<2x128xf32>
    %484 = arith.mulf %483, %17 : vector<2x128xf32>
    %485 = arith.addf %481, %484 : vector<2x128xf32>
    %c102 = arith.constant 102 : index
    %486 = memref.load %arg3[%c102] : memref<136xf32, #tpu.memory_space<smem>>
    %487 = vector.broadcast %486 : f32 to vector<2x128xf32>
    %488 = arith.mulf %487, %18 : vector<2x128xf32>
    %489 = arith.addf %485, %488 : vector<2x128xf32>
    %c103 = arith.constant 103 : index
    %490 = memref.load %arg3[%c103] : memref<136xf32, #tpu.memory_space<smem>>
    %491 = vector.broadcast %490 : f32 to vector<2x128xf32>
    %492 = arith.mulf %491, %20 : vector<2x128xf32>
    %493 = arith.addf %489, %492 : vector<2x128xf32>
    %c104 = arith.constant 104 : index
    %494 = memref.load %arg3[%c104] : memref<136xf32, #tpu.memory_space<smem>>
    %495 = vector.broadcast %494 : f32 to vector<2x128xf32>
    %496 = arith.mulf %495, %23 : vector<2x128xf32>
    %497 = arith.addf %493, %496 : vector<2x128xf32>
    %c105 = arith.constant 105 : index
    %498 = memref.load %arg3[%c105] : memref<136xf32, #tpu.memory_space<smem>>
    %499 = vector.broadcast %498 : f32 to vector<2x128xf32>
    %500 = arith.mulf %499, %24 : vector<2x128xf32>
    %501 = arith.addf %497, %500 : vector<2x128xf32>
    %c106 = arith.constant 106 : index
    %502 = memref.load %arg3[%c106] : memref<136xf32, #tpu.memory_space<smem>>
    %503 = vector.broadcast %502 : f32 to vector<2x128xf32>
    %504 = arith.mulf %503, %25 : vector<2x128xf32>
    %505 = arith.addf %501, %504 : vector<2x128xf32>
    %c107 = arith.constant 107 : index
    %506 = memref.load %arg3[%c107] : memref<136xf32, #tpu.memory_space<smem>>
    %507 = vector.broadcast %506 : f32 to vector<2x128xf32>
    %508 = arith.mulf %507, %27 : vector<2x128xf32>
    %509 = arith.addf %505, %508 : vector<2x128xf32>
    %c108 = arith.constant 108 : index
    %510 = memref.load %arg3[%c108] : memref<136xf32, #tpu.memory_space<smem>>
    %511 = vector.broadcast %510 : f32 to vector<2x128xf32>
    %512 = arith.mulf %511, %30 : vector<2x128xf32>
    %513 = arith.addf %509, %512 : vector<2x128xf32>
    %c109 = arith.constant 109 : index
    %514 = memref.load %arg3[%c109] : memref<136xf32, #tpu.memory_space<smem>>
    %515 = vector.broadcast %514 : f32 to vector<2x128xf32>
    %516 = arith.mulf %515, %31 : vector<2x128xf32>
    %517 = arith.addf %513, %516 : vector<2x128xf32>
    %c110 = arith.constant 110 : index
    %518 = memref.load %arg3[%c110] : memref<136xf32, #tpu.memory_space<smem>>
    %519 = vector.broadcast %518 : f32 to vector<2x128xf32>
    %520 = arith.mulf %519, %32 : vector<2x128xf32>
    %521 = arith.addf %517, %520 : vector<2x128xf32>
    %c111 = arith.constant 111 : index
    %522 = memref.load %arg3[%c111] : memref<136xf32, #tpu.memory_space<smem>>
    %523 = vector.broadcast %522 : f32 to vector<2x128xf32>
    %524 = arith.mulf %523, %34 : vector<2x128xf32>
    %525 = arith.addf %521, %524 : vector<2x128xf32>
    %c134 = arith.constant 134 : index
    %526 = memref.load %arg3[%c134] : memref<136xf32, #tpu.memory_space<smem>>
    %527 = vector.broadcast %526 : f32 to vector<2x128xf32>
    %528 = arith.addf %525, %527 : vector<2x128xf32>
    %c6_34 = arith.constant 6 : index
    %c0_35 = arith.constant 0 : index
    %c0_36 = arith.constant 0 : index
    %529 = vector.load %arg4[%c6_34, %c0_35, %c0_36] : memref<8x2x128xf32, #tpu.memory_space<vmem>>, vector<1x2x128xf32>
    %530 = vector.shape_cast %529 : vector<1x2x128xf32> to vector<2x128xf32>
    %531 = vector.shape_cast %528 : vector<2x128xf32> to vector<1x2x128xf32>
    tpu.vector_store %arg4[%c6_34, %c0_35, %c0_36], %531 {strides = array<i32>} : memref<8x2x128xf32, #tpu.memory_space<vmem>>, vector<1x2x128xf32>,
    %cst_37 = arith.constant 0.000000e+00 : f32
    %532 = vector.broadcast %cst_37 : f32 to vector<2x128xf32>
    %c112 = arith.constant 112 : index
    %533 = memref.load %arg3[%c112] : memref<136xf32, #tpu.memory_space<smem>>
    %534 = vector.broadcast %533 : f32 to vector<2x128xf32>
    %535 = arith.mulf %534, %9 : vector<2x128xf32>
    %536 = arith.addf %532, %535 : vector<2x128xf32>
    %c113 = arith.constant 113 : index
    %537 = memref.load %arg3[%c113] : memref<136xf32, #tpu.memory_space<smem>>
    %538 = vector.broadcast %537 : f32 to vector<2x128xf32>
    %539 = arith.mulf %538, %10 : vector<2x128xf32>
    %540 = arith.addf %536, %539 : vector<2x128xf32>
    %c114 = arith.constant 114 : index
    %541 = memref.load %arg3[%c114] : memref<136xf32, #tpu.memory_space<smem>>
    %542 = vector.broadcast %541 : f32 to vector<2x128xf32>
    %543 = arith.mulf %542, %11 : vector<2x128xf32>
    %544 = arith.addf %540, %543 : vector<2x128xf32>
    %c115 = arith.constant 115 : index
    %545 = memref.load %arg3[%c115] : memref<136xf32, #tpu.memory_space<smem>>
    %546 = vector.broadcast %545 : f32 to vector<2x128xf32>
    %547 = arith.mulf %546, %13 : vector<2x128xf32>
    %548 = arith.addf %544, %547 : vector<2x128xf32>
    %c116 = arith.constant 116 : index
    %549 = memref.load %arg3[%c116] : memref<136xf32, #tpu.memory_space<smem>>
    %550 = vector.broadcast %549 : f32 to vector<2x128xf32>
    %551 = arith.mulf %550, %16 : vector<2x128xf32>
    %552 = arith.addf %548, %551 : vector<2x128xf32>
    %c117 = arith.constant 117 : index
    %553 = memref.load %arg3[%c117] : memref<136xf32, #tpu.memory_space<smem>>
    %554 = vector.broadcast %553 : f32 to vector<2x128xf32>
    %555 = arith.mulf %554, %17 : vector<2x128xf32>
    %556 = arith.addf %552, %555 : vector<2x128xf32>
    %c118 = arith.constant 118 : index
    %557 = memref.load %arg3[%c118] : memref<136xf32, #tpu.memory_space<smem>>
    %558 = vector.broadcast %557 : f32 to vector<2x128xf32>
    %559 = arith.mulf %558, %18 : vector<2x128xf32>
    %560 = arith.addf %556, %559 : vector<2x128xf32>
    %c119 = arith.constant 119 : index
    %561 = memref.load %arg3[%c119] : memref<136xf32, #tpu.memory_space<smem>>
    %562 = vector.broadcast %561 : f32 to vector<2x128xf32>
    %563 = arith.mulf %562, %20 : vector<2x128xf32>
    %564 = arith.addf %560, %563 : vector<2x128xf32>
    %c120 = arith.constant 120 : index
    %565 = memref.load %arg3[%c120] : memref<136xf32, #tpu.memory_space<smem>>
    %566 = vector.broadcast %565 : f32 to vector<2x128xf32>
    %567 = arith.mulf %566, %23 : vector<2x128xf32>
    %568 = arith.addf %564, %567 : vector<2x128xf32>
    %c121 = arith.constant 121 : index
    %569 = memref.load %arg3[%c121] : memref<136xf32, #tpu.memory_space<smem>>
    %570 = vector.broadcast %569 : f32 to vector<2x128xf32>
    %571 = arith.mulf %570, %24 : vector<2x128xf32>
    %572 = arith.addf %568, %571 : vector<2x128xf32>
    %c122 = arith.constant 122 : index
    %573 = memref.load %arg3[%c122] : memref<136xf32, #tpu.memory_space<smem>>
    %574 = vector.broadcast %573 : f32 to vector<2x128xf32>
    %575 = arith.mulf %574, %25 : vector<2x128xf32>
    %576 = arith.addf %572, %575 : vector<2x128xf32>
    %c123 = arith.constant 123 : index
    %577 = memref.load %arg3[%c123] : memref<136xf32, #tpu.memory_space<smem>>
    %578 = vector.broadcast %577 : f32 to vector<2x128xf32>
    %579 = arith.mulf %578, %27 : vector<2x128xf32>
    %580 = arith.addf %576, %579 : vector<2x128xf32>
    %c124 = arith.constant 124 : index
    %581 = memref.load %arg3[%c124] : memref<136xf32, #tpu.memory_space<smem>>
    %582 = vector.broadcast %581 : f32 to vector<2x128xf32>
    %583 = arith.mulf %582, %30 : vector<2x128xf32>
    %584 = arith.addf %580, %583 : vector<2x128xf32>
    %c125 = arith.constant 125 : index
    %585 = memref.load %arg3[%c125] : memref<136xf32, #tpu.memory_space<smem>>
    %586 = vector.broadcast %585 : f32 to vector<2x128xf32>
    %587 = arith.mulf %586, %31 : vector<2x128xf32>
    %588 = arith.addf %584, %587 : vector<2x128xf32>
    %c126 = arith.constant 126 : index
    %589 = memref.load %arg3[%c126] : memref<136xf32, #tpu.memory_space<smem>>
    %590 = vector.broadcast %589 : f32 to vector<2x128xf32>
    %591 = arith.mulf %590, %32 : vector<2x128xf32>
    %592 = arith.addf %588, %591 : vector<2x128xf32>
    %c127 = arith.constant 127 : index
    %593 = memref.load %arg3[%c127] : memref<136xf32, #tpu.memory_space<smem>>
    %594 = vector.broadcast %593 : f32 to vector<2x128xf32>
    %595 = arith.mulf %594, %34 : vector<2x128xf32>
    %596 = arith.addf %592, %595 : vector<2x128xf32>
    %c135 = arith.constant 135 : index
    %597 = memref.load %arg3[%c135] : memref<136xf32, #tpu.memory_space<smem>>
    %598 = vector.broadcast %597 : f32 to vector<2x128xf32>
    %599 = arith.addf %596, %598 : vector<2x128xf32>
    %c7_38 = arith.constant 7 : index
    %c0_39 = arith.constant 0 : index
    %c0_40 = arith.constant 0 : index
    %600 = vector.load %arg4[%c7_38, %c0_39, %c0_40] : memref<8x2x128xf32, #tpu.memory_space<vmem>>, vector<1x2x128xf32>
    %601 = vector.shape_cast %600 : vector<1x2x128xf32> to vector<2x128xf32>
    %602 = vector.shape_cast %599 : vector<2x128xf32> to vector<1x2x128xf32>
    tpu.vector_store %arg4[%c7_38, %c0_39, %c0_40], %602 {strides = array<i32>} : memref<8x2x128xf32, #tpu.memory_space<vmem>>, vector<1x2x128xf32>,
    return
  }
  func.func @transform_0(%arg0: i32, %arg1: i32) -> (i32, i32, i32) {
    %c0_i32 = arith.constant 0 : i32
    %c0_i32_0 = arith.constant 0 : i32
    return %c0_i32, %arg0, %arg1 : i32, i32, i32
  }
  func.func @transform_1(%arg0: i32, %arg1: i32) -> i32 {
    %c0_i32 = arith.constant 0 : i32
    %c0_i32_0 = arith.constant 0 : i32
    return %c0_i32 : i32
  }
  func.func @transform_2(%arg0: i32, %arg1: i32) -> (i32, i32, i32) {
    %c0_i32 = arith.constant 0 : i32
    %c0_i32_0 = arith.constant 0 : i32
    return %c0_i32, %arg0, %arg1 : i32, i32, i32
  }
}

</mosaic_0001>

<bundles_post_ra>
// kernel: tpu_custom_call.1
= control target key start
LH: loop header
LB: loop body
LE: loop exit
PB: predicated region body
PF: predicated region fallthrough
CT: control target
= control target key end

     0   :  { %7 = vsyncpa [#allocation4], 0  ;;  %s3238_s0 = inlined_call_operand.hbm [shape: f32[4,2,200], index: 0, kind: input, shape index: {}]   ;;  %s3239_s1 = inlined_call_operand.vmem [shape: f32[136], index: 1, kind: input, shape index: {}]   ;;  %s3240_s2 = inlined_call_operand.hbm [shape: f32[8,2,200], index: 2, kind: output, shape index: {}]  }
   0x1   :  { %9 = vsyncpa [#allocation4 + $0x1], 0 }
   0x2   :  { %10 = vsyncpa [#allocation6], 0 }
   0x3   :  { %11 = vsyncpa [#allocation5], 0 }
   0x4   :  { %13 = vsyncpa [#allocation5 + $0x1], 0  ;;  %s2283_s9 = smov 0   ;;  %s2285_s10 = smov 0  }
   0x5   :  { %s2287_s11 = smov 0   ;;  %s2289_s12 = smov 0  }
   0x6   :  { %s2291_s13 = smov 0   ;;  %s2293_s14 = smov 0  }
   0x7 LB: > { %s1879_s15 = sadd.s32 4294967295, %s2252_s14   ;;  %s1880_s16 = sadd.s32 4294967294, %s2252_s14   ;;  %s2252_s14 = sphi %s2293_s14, %s19_s14   ;;  %s2248_s13 = sphi %s2291_s13, %s3263_s13   ;;  %s2244_s12 = sphi %s2289_s12, %s3262_s12   ;;  %s2240_s11 = sphi %s2287_s11, %s3261_s11   ;;  %s2236_s10 = sphi %s2285_s10, %s3260_s10   ;;  %s2232_s9 = sphi %s2283_s9, %s3259_s9  }
   0x8   : > { %s40_s17 = sadd.s32 1, %s2240_s11  ;;  %p47_p0 = scmp.ne.s32.totalorder %s2240_s11, %s2236_s10 }
   0x9   : > { %p48_p1 = scmp.eq.s32.totalorder %s2252_s14, 0  ;;  %p53_p2 = scmp.ne.s32.totalorder %s2236_s10, %s2232_s9 }
   0xa   : > { %p2321_p3 = scmp.eq.s32.totalorder %s1879_s15, 0  ;;  %p100_p4 = scmp.eq.s32.totalorder %s1879_s15, 1 }
   0xb   : > { %p2325_p5 = por %p48_p1, %p47_p0  ;;  %p106_p6 = scmp.eq.s32.totalorder %s1880_s16, 1 }
   0xc   : > { %s3245_s18 = scalar_select %p2321_p3, 1, 0 }
   0xd   : > { %p2331_p7 = por %p2321_p3, %p53_p2  ;;  %p2335_p8 = por %p100_p4, %p47_p0 }
   0xe   : > { %p2339_p9 = por %p106_p6, %p53_p2  ;;  %p1881_p10 = scmp.ge.s32.totalorder %s2252_s14, 1 }
   0xf   : > { %s3247_s20 = scalar_select %p2331_p7, 1, 0 }
  0x10   : > { %s3248_s21 = scalar_select %p2335_p8, 1, 0 }
  0x11   : > { %s3249_s22 = scalar_select %p2339_p9, 1, 0 }
  0x12   : > { %p113_p11 = scmp.lt.s32.totalorder %s2252_s14, 3  ;;  %s126_s25 = sshll.u32 %s3239_s1, 4  ;;  %s127_s25 = int_to_ptr.vmem [resolvable:$true] %s126_s25 }
  0x13   : > { %p2058_p0 = scmp.lt.s32.totalorder %s2252_s14, 2  ;;  %s28_s29 = sadd.s32 1, %s2248_s13 }
  0x14   : > { %p2348_p12 = pnand %p1881_p10, %p113_p11  ;;  %p2369_p6 = scmp.ge.s32.totalorder %s28_s29, 2 }
  0x15   : > { %p2358_p2 = pnand %p2058_p0, %p2325_p5  ;;  %s137_s3 = sand.u32 1, %s2240_s11  }
  0x16   : > { %p2045_p1 = pneg %p2348_p12  ;;  %s2121_s4 = scalar_lea.vmem %s127_s25, 32 }
  0x17   : > { %p2122_p10 = scmp.ne.s32.totalorder %s127_s25, %s2121_s4  ;;  %p2129_p13 = scmp.lt.s32.totalorder %s127_s25, %s127_s25 }
  0x18   : > { %p2364_p4 = pnand %p2045_p1, %p2321_p3  ;;  %p2130_p9 = scmp.lt.s32.totalorder %s2121_s4, %s2121_s4 }
  0x1a   : > { %p2123_p11 = pneg %p2364_p4  ;;  %p2131_p8 = por %p2130_p9, %p2129_p13 }
  0x1c   : > { %p2124_p5 = pnand %p2123_p11, %p2122_p10 }
  0x1e   : > { %p2125_p0 = pneg %p2124_p5 }
  0x20   : > { %p2132_p1 = pnand %p2131_p8, %p2125_p0 }
  0x22   : > { %2135 = shalt.err (!%p2132_p1)
}
  0x23   : > { %s2254_s5 = smov [#allocation7]   ;;  %s3265_s29 = smov (%p2369_p6, %s28_s29), 0 }
  0x24   : > { %2048 = dma.vmem_to_smem (!%p2364_p4), %s127_s25, 32, %s2254_s5, [#allocation6]  }
  0x25   : > { %s1884_s6 = sshll.u32 %s137_s3, 3  ;;  %s36_s7 = ssub.s32 %s2248_s13, %s3265_s29 }
  0x26   : > { %p38_p9 = scmp.eq.s32.totalorder %s36_s7, 0  ;;  %s1885_s8 = sshll.u32 %s2248_s13, 5 }
  0x27   : > { %s2388_s19 = scalar_lea.hbm %s3238_s0, %s1885_s8  ;;  %s141_s23 = scalar_lea.vmem [#allocation3], %s1884_s6 }
  0x28   : > { %s149_s24 = sshll.u32 %s141_s23, 4  ;;  %s2397_s28 = scalar_lea.sflag [#allocation4], %s137_s3  ;;  %s2395_s24 = int_to_ptr.vmem [resolvable:$true] %s149_s24 }
  0x29   : > { %s2393_s25 = scalar_select %p38_p9, %s2240_s11, %s40_s17  }
  0x2a   : > { %s2136_s30 = scalar_lea.hbm %s2388_s19, 128  ;;  %p2138_p13 = pneg %p2358_p2 }
  0x2b   : > { %p2137_p8 = scmp.ne.s32.totalorder %s2388_s19, %s2136_s30  ;;  %s2141_s6 = scalar_lea.hbm %s3238_s0, 256 }
  0x2c   : > { %p2142_p10 = scmp.lt.u32.totalorder %s2388_s19, %s3238_s0  ;;  %p2143_p11 = scmp.lt.u32.totalorder %s2141_s6, %s2136_s30 }
  0x2d   : > { %p2139_p4 = pnand %p2138_p13, %p2137_p8  ;;  %p2145_p0 = scmp.lt.u32.totalorder %s2136_s30, %s2388_s19 }
  0x2e   : > { %p2144_p5 = por %p2143_p11, %p2142_p10 }
  0x2f   : > { %p2140_p6 = pneg %p2139_p4 }
  0x30   : > { %p2146_p1 = por %p2145_p0, %p2144_p5 }
  0x32   : > { %p2147_p9 = pnand %p2146_p1, %p2140_p6 }
  0x34   : > { %2150 = shalt.err (!%p2147_p9)
}
  0x35   : > { %s2151_s17 = scalar_lea.vmem %s2395_s24, 128  ;;  %s2255_s3 = smov [#allocation3]  }
  0x36   : > { %p2152_p8 = scmp.ne.s32.totalorder %s2395_s24, %s2151_s17  ;;  %s2156_s15 = sshll.u32 %s2255_s3, 4  ;;  %s2157_s15 = int_to_ptr.vmem [resolvable:$false] %s2156_s15 }
  0x37   : > { %s2158_s16 = scalar_lea.vmem %s2157_s15, 256  ;;  %p2159_p7 = scmp.lt.s32.totalorder %s2395_s24, %s2157_s15 }
  0x38   : > { %p2154_p4 = pnand %p2152_p8, %p2138_p13  ;;  %p2160_p10 = scmp.lt.s32.totalorder %s2158_s16, %s2151_s17 }
  0x3a   : > { %p2155_p3 = pneg %p2154_p4  ;;  %p2161_p11 = por %p2160_p10, %p2159_p7 }
  0x3c   : > { %p2162_p5 = pnand %p2161_p11, %p2155_p3 }
  0x3e   : > { %2165 = shalt.err (!%p2162_p5)
}
  0x3f   : > { %s2256_s23 = smov 64   ;;  %s2257_s30 = smov 32  }
  0x40   : > { %s2258_s4 = smov 2   ;;  %161 = sbr.rel (%p2348_p12) target bundleno = 886 (0x376), region = 28 }
  0x41   : > { %2052 = dma.hbm_to_vmem [thread:$0]  (!%p2358_p2), %s2388_s19, 128, %s2395_s24, %s2397_s28, %s2256_s23, %s2257_s30, %s2258_s4  }
  0x42   : > { %s2428_s5 = sand.u32 (!%p2348_p12), 1, %s2236_s10   ;;  %p3254_p3 = scmp.ne.s32.totalorder (!%p2348_p12), %s3247_s20, 0 }
  0x43   : > { %s1887_s6 = sshll.u32 (!%p2348_p12), %s2428_s5, 3  ;;  %s164_s7 = scalar_lea.sflag (!%p2348_p12), [#allocation4], %s2428_s5 }
  0x44   : > { %s2432_s8 = scalar_lea.vmem (!%p2348_p12), [#allocation3], %s1887_s6 }
  0x47   : > { %2219 = dma.done.wait (%p3254_p3), %s164_s7, 128  }
  0x48   : > { %2221 = vsyncadd (%p3254_p3), %s164_s7, 4294967168  ;;  %p3255_p7 = scmp.ne.s32.totalorder %s3245_s18, 0 }
  0x4a   : > { %2223 = dma.done.wait (%p3255_p7), [#allocation6], 32  }
  0x4b   : > { %2225 = vsyncadd (%p3255_p7), [#allocation6], 4294967264 }
  0x4c   : > { %176 = sfence }
  0x4d   : > { %s1889_s26 = sshll.u32 %s2428_s5, 4  ;;  %p1890_p12 = scmp.ne.s32.totalorder %s2244_s12, 0 }
  0x4e   : > { %s2443_s27 = scalar_lea.vmem [#allocation8], %s1889_s26  ;;  %v2259_v0 = vmov (!%p1890_p12), 0.0  }
  0x4f   : > { %196 = sbr.rel (%p1890_p12) target bundleno = 86 (0x56), region = 40  ;;  %197 = vst [vmem:[#allocation2] sm:$0x3] (!%p1890_p12), %v2259_v0  ;;  %198 = vst [vmem:[#allocation2 + $0x2] sm:$0x3] (!%p1890_p12), %v2259_v0 }
  0x50   : > { %199 = vst [vmem:[#allocation2 + $0x4] sm:$0x3] (!%p1890_p12), %v2259_v0  ;;  %200 = vst [vmem:[#allocation2 + $0x6] sm:$0x3] (!%p1890_p12), %v2259_v0 }
  0x56 PF: > { %s1892_s20 = sld [smem:[#allocation7 + $0x2]]  ;;  %v2446_v1 = vld [vmem:[#allocation2] sm:$0x3]  ;;  %v2449_v2 = vld [vmem:[%s2432_s8] sm:$0x3]  ;;  %s1891_s18 = sld [smem:[#allocation7 + $0x1]] }
  0x57   : > { %209 = vst [vmem:[#allocation2] sm:$0x3] %v2449_v2  ;;  %s2452_s19 = sld [smem:[#allocation7 + $0x5]]  ;;  %v2454_v3 = vld [vmem:[#allocation2 + $0x2] sm:$0x3]  ;;  %s1893_s24 = sld [smem:[#allocation7 + $0x3]] }
  0x58   : > { %v2457_v4 = vld [vmem:[%s2432_s8 + $0x2] sm:$0x3]  ;;  %v2461_v5 = vld [vmem:[%s2432_s8 + $0x4] sm:$0x3]  ;;  %v2463_v6 = vld [vmem:[#allocation2 + $0x4] sm:$0x3] }
  0x59   : > { %210 = vst [vmem:[#allocation2 + $0x2] sm:$0x3] %v2457_v4  ;;  %s2465_s28 = sld [smem:[#allocation7 + $0x6]]  ;;  %211 = vst [vmem:[#allocation2 + $0x4] sm:$0x3] %v2461_v5  ;;  %s2260_s17 = smov 124  }
  0x5a   : > { %v2468_v8 = vld [vmem:[#allocation2 + $0x6] sm:$0x3]  ;;  %v2471_v9 = vld [vmem:[%s2432_s8 + $0x6] sm:$0x3]  ;;  %s2261_s3 = smov 126   ;;  %s1897_s15 = sld [smem:[#allocation7 + $0x7]] }
  0x5b   : > { %212 = vst [vmem:[#allocation2 + $0x6] sm:$0x3] %v2471_v9  ;;  %s1899_s16 = sld [smem:[#allocation7 + $0x9]]  ;;  %s2262_s23 = smov 122   ;;  %vm229_vm0 = vcmask 1031168   ;;  %vm245_vm1 = vcmask 1014784  }
  0x5c   : > { %v236_v7 = vstv %s1892_s20  ;;  %v220_v11 = vstv %s1891_s18  ;;  %s1900_s30 = sld [smem:[#allocation7 + $0xa]]  ;;  %s1903_s4 = sld [smem:[#allocation7 + $0xd]]  ;;  %vm405_vm2 = vcmask 48128  }
  0x5d   : > { %v237_v10 = vmul.f32 %v236_v7, %v2446_v1  ;;  %v221_v12 = vmul.f32 %v220_v11, %v2446_v1  ;;  %v238_v13 = vmul.f32 %v236_v7, %v2449_v2  ;;  %v222_v14 = vmul.f32 %v220_v11, %v2449_v2  ;;  %s1901_s6 = sld [smem:[#allocation7 + $0xb]]  ;;  %s1904_s7 = sld [smem:[#allocation7 + $0xe]] }
  0x5e   : > { %v267_v15 = vstv %s2452_s19  ;;  %v252_v16 = vstv %s1893_s24  ;;  %s1905_s8 = sld [smem:[#allocation7 + $0xf]]  ;;  %s1908_s26 = sld [smem:[#allocation7 + $0x11]] }
  0x5f   : > { %241 = vrot.lane.b32.xlu1 %v237_v10, %s2260_s17  ;;  %225 = vrot.lane.b32.xlu0 %v221_v12, %s2261_s3  ;;  %v268_v17 = vmul.f32 %v267_v15, %v2454_v3  ;;  %v253_v18 = vmul.f32 %v252_v16, %v2449_v2  ;;  %v282_v19 = vstv %s2465_s28  ;;  %v269_v21 = vmul.f32 %v267_v15, %v2457_v4  ;;  %s1909_s20 = sld [smem:[#allocation7 + $0x12]]  ;;  %s1912_s18 = sld [smem:[#allocation7 + $0x15]] }
  0x60   : > { %v283_v20 = vmul.f32 %v282_v19, %v2454_v3  ;;  %v297_v22 = vstv %s1897_s15  ;;  %v284_v24 = vmul.f32 %v282_v19, %v2457_v4  ;;  %s1910_s19 = sld [smem:[#allocation7 + $0x13]]  ;;  %s1913_s24 = sld [smem:[#allocation7 + $0x16]] }
  0x61   : > { %v298_v23 = vmul.f32 %v297_v22, %v2457_v4  ;;  %v312_v25 = vstv %s1899_s16  ;;  %s1914_s28 = sld [smem:[#allocation7 + $0x17]]  ;;  %s1916_s15 = sld [smem:[#allocation7 + $0x19]] }
  0x62   : > { %v314_v26 = vmul.f32 %v312_v25, %v2461_v5  ;;  %v313_v27 = vmul.f32 %v312_v25, %v2463_v6  ;;  %v327_v28 = vstv %s1900_s30  ;;  %v357_v31 = vstv %s1903_s4  ;;  %s1917_s16 = sld [smem:[#allocation7 + $0x1a]]  ;;  %s1920_s30 = sld [smem:[#allocation7 + $0x1d]] }
  0x63   : > { %243 = vrot.lane.b32.xlu1 %v238_v13, %s2260_s17  ;;  %227 = vrot.lane.b32.xlu0 %v222_v14, %s2261_s3  ;;  %v329_v29 = vmul.f32 %v327_v28, %v2461_v5  ;;  %v328_v30 = vmul.f32 %v327_v28, %v2463_v6  ;;  %v342_v32 = vstv %s1901_s6  ;;  %v358_v33 = vmul.f32 %v357_v31, %v2468_v8  ;;  %s1918_s4 = sld [smem:[#allocation7 + $0x1b]]  ;;  %s1921_s6 = sld [smem:[#allocation7 + $0x1e]] }
  0x64   : > { %v343_v34 = vmul.f32 %v342_v32, %v2461_v5  ;;  %v372_v35 = vstv %s1904_s7  ;;  %v359_v37 = vmul.f32 %v357_v31, %v2471_v9  ;;  %v387_v38 = vstv %s1905_s8  ;;  %s1922_s7 = sld [smem:[#allocation7 + $0x1f]]  ;;  %s1926_s8 = sld [smem:[#allocation7 + $0x21]] }
  0x65   : > { %v373_v36 = vmul.f32 %v372_v35, %v2468_v8  ;;  %v388_v39 = vmul.f32 %v387_v38, %v2471_v9  ;;  %v374_v40 = vmul.f32 %v372_v35, %v2471_v9  ;;  %v416_v41 = vstv %s1908_s26  ;;  %s1927_s26 = sld [smem:[#allocation7 + $0x22]]  ;;  %p3256_p13 = scmp.ne.s32.totalorder %s3248_s21, 0 }
  0x66   : > { %v418_v42 = vmul.f32 %v416_v41, %v2449_v2  ;;  %v417_v43 = vmul.f32 %v416_v41, %v2446_v1  ;;  %v431_v44 = vstv %s1909_s20  ;;  %v461_v47 = vstv %s1912_s18  ;;  %s1930_s20 = sld [smem:[#allocation7 + $0x25]]  ;;  %s1928_s18 = sld [smem:[#allocation7 + $0x23]] }
  0x67   : > { %272 = vrot.lane.b32.xlu1 %v268_v17, %s2261_s3  ;;  %255 = vrot.lane.b32.xlu0 %v253_v18, %s2262_s23  ;;  %v433_v45 = vmul.f32 %v431_v44, %v2449_v2  ;;  %v432_v46 = vmul.f32 %v431_v44, %v2446_v1  ;;  %v446_v48 = vstv %s1910_s19  ;;  %v462_v49 = vmul.f32 %v461_v47, %v2454_v3  ;;  %s1931_s19 = sld [smem:[#allocation7 + $0x26]] }
  0x68   : > { %v447_v50 = vmul.f32 %v446_v48, %v2449_v2  ;;  %v476_v51 = vstv %s1913_s24  ;;  %v463_v53 = vmul.f32 %v461_v47, %v2457_v4  ;;  %v491_v54 = vstv %s1914_s28  ;;  %s1932_s24 = sld [smem:[#allocation7 + $0x27]]  ;;  %s1934_s28 = sld [smem:[#allocation7 + $0x29]] }
  0x69   : > { %v477_v52 = vmul.f32 %v476_v51, %v2454_v3  ;;  %v492_v55 = vmul.f32 %v491_v54, %v2457_v4  ;;  %v478_v56 = vmul.f32 %v476_v51, %v2457_v4  ;;  %v506_v57 = vstv %s1916_s15  ;;  %s1935_s15 = sld [smem:[#allocation7 + $0x2a]] }
  0x6a   : > { %v508_v58 = vmul.f32 %v506_v57, %v2461_v5  ;;  %v507_v59 = vmul.f32 %v506_v57, %v2463_v6  ;;  %v521_v60 = vstv %s1917_s16  ;;  %v551_v63 = vstv %s1920_s30  ;;  %s1938_s16 = sld [smem:[#allocation7 + $0x2d]]  ;;  %s1936_s30 = sld [smem:[#allocation7 + $0x2b]] }
  0x6b   : > { %287 = vrot.lane.b32.xlu1 %v283_v20, %s2260_s17  ;;  %274 = vrot.lane.b32.xlu0 %v269_v21, %s2261_s3  ;;  %v523_v61 = vmul.f32 %v521_v60, %v2461_v5  ;;  %v522_v62 = vmul.f32 %v521_v60, %v2463_v6  ;;  %v536_v0 = vstv %s1918_s4  ;;  %v552_v7 = vmul.f32 %v551_v63, %v2468_v8  ;;  %s1939_s4 = sld [smem:[#allocation7 + $0x2e]] }
  0x6c   : > { %v537_v10 = vmul.f32 %v536_v0, %v2461_v5  ;;  %v566_v11 = vstv %s1921_s6  ;;  %v553_v13 = vmul.f32 %v551_v63, %v2471_v9  ;;  %v581_v14 = vstv %s1922_s7  ;;  %s1940_s6 = sld [smem:[#allocation7 + $0x2f]]  ;;  %s213_s7 = sld [smem:[#allocation7]] }
  0x6d   : > { %v567_v12 = vmul.f32 %v566_v11, %v2468_v8  ;;  %v582_v15 = vmul.f32 %v581_v14, %v2471_v9  ;;  %v568_v16 = vmul.f32 %v566_v11, %v2471_v9  ;;  %v610_v17 = vstv %s1926_s8  ;;  %s1944_s8 = sld [smem:[#allocation7 + $0x31]] }
  0x6e   : > { %v612_v18 = vmul.f32 %v610_v17, %v2449_v2  ;;  %v611_v19 = vmul.f32 %v610_v17, %v2446_v1  ;;  %v625_v20 = vstv %s1927_s26  ;;  %s2590_s26 = sld [smem:[#allocation7 + $0x32]] }
  0x6f   : > { %300 = vrot.lane.b32.xlu1 %v298_v23, %s2262_s23  ;;  %289 = vrot.lane.b32.xlu0 %v284_v24, %s2260_s17  ;;  %v627_v21 = vmul.f32 %v625_v20, %v2449_v2  ;;  %v626_v22 = vmul.f32 %v625_v20, %v2446_v1  ;;  %v655_v23 = vstv %s1930_s20  ;;  %v640_v24 = vstv %s1928_s18  ;;  %s2592_s20 = sld [smem:[#allocation7 + $0x4]]  ;;  %s2598_s18 = sld [smem:[#allocation7 + $0x35]] }
  0x70   : > { %v656_v25 = vmul.f32 %v655_v23, %v2454_v3 }
  0x73   : > { %319 = vrot.lane.b32.xlu1 %v314_v26, %s2261_s3  ;;  %317 = vrot.lane.b32.xlu0 %v313_v27, %s2261_s3  ;;  %v641_v26 = vmul.f32 %v640_v24, %v2449_v2  ;;  %v670_v27 = vstv %s1931_s19  ;;  %s2600_s19 = sld [smem:[#allocation7 + $0x33]] }
  0x74   : > { %v671_v28 = vmul.f32 %v670_v27, %v2454_v3  ;;  %v672_v32 = vmul.f32 %v670_v27, %v2457_v4  ;;  %v819_v57 = vstv %s2590_s26  ;;  %s2263_s26 = smov 6  }
  0x75   : > { %v261_v60 = vstv %s2592_s20  ;;  %v821_v63 = vmul.f32 %v819_v57, %v2449_v2  ;;  %s1915_s20 = sld [smem:[#allocation7 + $0x18]] }
  0x76   : > { %v263_v14 = vmul.f32 %v261_v60, %v2457_v4  ;;  %v262_v17 = vmul.f32 %v261_v60, %v2454_v3 }
  0x77   : > { %334 = vrot.lane.b32.xlu1 %v329_v29, %s2260_s17  ;;  %332 = vrot.lane.b32.xlu0 %v328_v30, %s2260_s17  ;;  %v657_v29 = vmul.f32 %v655_v23, %v2457_v4  ;;  %v685_v30 = vstv %s1932_s24  ;;  %s2609_s24 = sld [smem:[#allocation7 + $0x36]] }
  0x78   : > { %v686_v31 = vmul.f32 %v685_v30, %v2457_v4 }
  0x7b   : > { %362 = vrot.lane.b32.xlu1 %v358_v33, %s2261_s3  ;;  %345 = vrot.lane.b32.xlu0 %v343_v34, %s2262_s23  ;;  %v700_v33 = vstv %s1934_s28  ;;  %s2616_s28 = sld [smem:[#allocation7 + $0x8]] }
  0x7c   : > { %v702_v34 = vmul.f32 %v700_v33, %v2461_v5  ;;  %v701_v35 = vmul.f32 %v700_v33, %v2463_v6 }
  0x7d   : > { %v864_v23 = vstv %s2609_s24  ;;  %s1923_s24 = sld [smem:[#allocation7 + $0x81]] }
  0x7f   : > { %377 = vrot.lane.b32.xlu1 %v373_v36, %s2260_s17  ;;  %364 = vrot.lane.b32.xlu0 %v359_v37, %s2261_s3  ;;  %v715_v36 = vstv %s1935_s15  ;;  %s2620_s15 = sld [smem:[#allocation7 + $0x37]] }
  0x80   : > { %v717_v37 = vmul.f32 %v715_v36, %v2461_v5  ;;  %v716_v38 = vmul.f32 %v715_v36, %v2463_v6 }
  0x81   : > { %v306_v30 = vstv %s2616_s28  ;;  %s1929_s28 = sld [smem:[#allocation7 + $0x24]] }
  0x83   : > { %390 = vrot.lane.b32.xlu1 %v388_v39, %s2262_s23  ;;  %379 = vrot.lane.b32.xlu0 %v374_v40, %s2260_s17  ;;  %v745_v39 = vstv %s1938_s16  ;;  %v730_v40 = vstv %s1936_s30  ;;  %s2631_s16 = sld [smem:[#allocation7 + $0x39]]  ;;  %s2640_s30 = sld [smem:[#allocation7 + $0x3a]] }
  0x84   : > { %v746_v41 = vmul.f32 %v745_v39, %v2468_v8 }
  0x87   : > { %423 = vrot.lane.b32.xlu1 %v418_v42, %s2261_s3  ;;  %421 = vrot.lane.b32.xlu0 %v417_v43, %s2261_s3  ;;  %v731_v42 = vmul.f32 %v730_v40, %v2461_v5  ;;  %v760_v43 = vstv %s1939_s4  ;;  %s2642_s4 = sld [smem:[#allocation7 + $0xc]] }
  0x88   : > { %v761_v44 = vmul.f32 %v760_v43, %v2468_v8  ;;  %v762_v48 = vmul.f32 %v760_v43, %v2471_v9  ;;  %v866_v43 = vmul.f32 %v864_v23, %v2457_v4 }
  0x8b   : > { %438 = vrot.lane.b32.xlu1 %v433_v45, %s2260_s17  ;;  %436 = vrot.lane.b32.xlu0 %v432_v46, %s2260_s17  ;;  %v747_v45 = vmul.f32 %v745_v39, %v2471_v9  ;;  %v775_v46 = vstv %s1940_s6  ;;  %v308_v39 = vmul.f32 %v306_v30, %v2461_v5  ;;  %s1907_s6 = sld [smem:[#allocation7 + $0x10]] }
  0x8c   : > { %v776_v47 = vmul.f32 %v775_v46, %v2471_v9 }
  0x8f   : > { %466 = vrot.lane.b32.xlu1 %v462_v49, %s2261_s3  ;;  %449 = vrot.lane.b32.xlu0 %v447_v50, %s2262_s23  ;;  %v214_v49 = vstv %s213_s7  ;;  %v804_v50 = vstv %s1944_s8  ;;  %s1906_s7 = sld [smem:[#allocation7 + $0x80]]  ;;  %s1911_s8 = sld [smem:[#allocation7 + $0x14]] }
  0x90   : > { %v806_v54 = vmul.f32 %v804_v50, %v2449_v2 }
  0x93   : > { %481 = vrot.lane.b32.xlu1 %v477_v52, %s2260_s17  ;;  %468 = vrot.lane.b32.xlu0 %v463_v53, %s2261_s3  ;;  %v216_v53 = vmul.f32 %v214_v49, %v2449_v2 }
  0x97   : > { %494 = vrot.lane.b32.xlu1 %v492_v55, %s2262_s23  ;;  %483 = vrot.lane.b32.xlu0 %v478_v56, %s2260_s17  ;;  %v215_v55 = vmul.f32 %v214_v49, %v2446_v1  ;;  %v805_v56 = vmul.f32 %v804_v50, %v2446_v1 }
  0x9b   : > { %513 = vrot.lane.b32.xlu1 %v508_v58, %s2261_s3  ;;  %511 = vrot.lane.b32.xlu0 %v507_v59, %s2261_s3 }
  0x9f   : > { %528 = vrot.lane.b32.xlu1 %v523_v61, %s2260_s17  ;;  %526 = vrot.lane.b32.xlu0 %v522_v62, %s2260_s17 }
  0xa3   : > { %556 = vrot.lane.b32.xlu1 %v552_v7, %s2261_s3  ;;  %539 = vrot.lane.b32.xlu0 %v537_v10, %s2262_s23  ;;  %v820_v7 = vmul.f32 %v819_v57, %v2446_v1  ;;  %v849_v10 = vstv %s2598_s18  ;;  %s1919_s18 = sld [smem:[#allocation7 + $0x1c]] }
  0xa4   : > { %v850_v20 = vmul.f32 %v849_v10, %v2454_v3 }
  0xa7   : > { %571 = vrot.lane.b32.xlu1 %v567_v12, %s2260_s17  ;;  %558 = vrot.lane.b32.xlu0 %v553_v13, %s2261_s3 }
  0xab   : > { %584 = vrot.lane.b32.xlu1 %v582_v15, %s2262_s23  ;;  %573 = vrot.lane.b32.xlu0 %v568_v16, %s2260_s17  ;;  %v834_v15 = vstv %s2600_s19  ;;  %s1925_s19 = sld [smem:[#allocation7 + $0x20]] }
  0xaf   : > { %617 = vrot.lane.b32.xlu1 %v612_v18, %s2261_s3  ;;  %615 = vrot.lane.b32.xlu0 %v611_v19, %s2261_s3 }
  0xb3   : > { %632 = vrot.lane.b32.xlu1 %v627_v21, %s2260_s17  ;;  %630 = vrot.lane.b32.xlu0 %v626_v22, %s2260_s17  ;;  %v835_v22 = vmul.f32 %v834_v15, %v2449_v2 }
  0xb7   : > { %660 = vrot.lane.b32.xlu1 %v656_v25, %s2261_s3  ;;  %643 = vrot.lane.b32.xlu0 %v641_v26, %s2262_s23 }
  0xbb   : > { %675 = vrot.lane.b32.xlu1 %v671_v28, %s2260_s17  ;;  %662 = vrot.lane.b32.xlu0 %v657_v29, %s2261_s3  ;;  %v865_v29 = vmul.f32 %v864_v23, %v2454_v3 }
  0xbf   : > { %688 = vrot.lane.b32.xlu1 %v686_v31, %s2262_s23  ;;  %677 = vrot.lane.b32.xlu0 %v672_v32, %s2260_s17  ;;  %v851_v31 = vmul.f32 %v849_v10, %v2457_v4  ;;  %v879_v32 = vstv %s2620_s15  ;;  %s1933_s15 = sld [smem:[#allocation7 + $0x28]] }
  0xc0   : > { %v880_v40 = vmul.f32 %v879_v32, %v2457_v4 }
  0xc3   : > { %707 = vrot.lane.b32.xlu1 %v702_v34, %s2261_s3  ;;  %705 = vrot.lane.b32.xlu0 %v701_v35, %s2261_s3 }
  0xc7   : > { %722 = vrot.lane.b32.xlu1 %v717_v37, %s2260_s17  ;;  %720 = vrot.lane.b32.xlu0 %v716_v38, %s2260_s17 }
  0xcb   : > { %750 = vrot.lane.b32.xlu1 %v746_v41, %s2261_s3  ;;  %733 = vrot.lane.b32.xlu0 %v731_v42, %s2262_s23  ;;  %v307_v42 = vmul.f32 %v306_v30, %v2463_v6 }
  0xcf   : > { %765 = vrot.lane.b32.xlu1 %v761_v44, %s2260_s17  ;;  %752 = vrot.lane.b32.xlu0 %v747_v45, %s2261_s3  ;;  %v894_v44 = vstv %s2631_s16  ;;  %s1937_s16 = sld [smem:[#allocation7 + $0x2c]] }
  0xd0   : > { %v896_v50 = vmul.f32 %v894_v44, %v2461_v5 }
  0xd1   : > { %v242_v51 = vpop.permute.xlu1 %241  ;;  %v226_v52 = vpop.permute.xlu0 %225 }
  0xd3   : > { %778 = vrot.lane.b32.xlu1 %v776_v47, %s2262_s23  ;;  %767 = vrot.lane.b32.xlu0 %v762_v48, %s2260_s17 }
  0xd5   : > { %v244_v58 = vpop.permute.xlu1 %243  ;;  %v228_v59 = vpop.permute.xlu0 %227 }
  0xd6   : > { %v230_v61 = vsel %vm229_vm0, %v226_v52, %v228_v59  ;;  %v234_v62 = vadd.f32 %v228_v59, %v216_v53  ;;  %v246_v11 = vsel %vm245_vm1, %v242_v51, %v244_v58  ;;  %v895_v52 = vmul.f32 %v894_v44, %v2463_v6 }
  0xd7   : > { %811 = vrot.lane.b32.xlu1 %v806_v54, %s2261_s3  ;;  %v233_v0 = vadd.f32 %v230_v61, %v215_v55  ;;  %809 = vrot.lane.b32.xlu0 %v805_v56, %s2261_s3  ;;  %v909_v53 = vstv %s2640_s30  ;;  %v351_v59 = vstv %s2642_s4  ;;  %s1941_s30 = sld [smem:[#allocation7 + $0x82]]  ;;  %s2704_s4 = sld [smem:[#allocation7 + $0x3d]] }
  0xd8   : > { %v250_v13 = vadd.f32 %v244_v58, %v234_v62  ;;  %v911_v61 = vmul.f32 %v909_v53, %v2461_v5  ;;  %v353_v10 = vmul.f32 %v351_v59, %v2471_v9 }
  0xd9   : > { %v273_v12 = vpop.permute.xlu1 %272  ;;  %v249_v16 = vadd.f32 %v246_v11, %v233_v0  ;;  %v256_v18 = vpop.permute.xlu0 %255  ;;  %v352_v11 = vmul.f32 %v351_v59, %v2468_v8 }
  0xda   : > { %v259_v19 = vadd.f32 %v256_v18, %v250_v13 }
  0xdb   : > { %826 = vrot.lane.b32.xlu1 %v821_v63, %s2260_s17  ;;  %v258_v21 = vadd.f32 %v256_v18, %v249_v16  ;;  %824 = vrot.lane.b32.xlu0 %v820_v7, %s2260_s17  ;;  %v910_v63 = vmul.f32 %v909_v53, %v2463_v6 }
  0xdc   : > { %v265_v25 = vadd.f32 %v263_v14, %v259_v19 }
  0xdd   : > { %v288_v24 = vpop.permute.xlu1 %287  ;;  %v264_v26 = vadd.f32 %v262_v17, %v258_v21  ;;  %v275_v27 = vpop.permute.xlu0 %274 }
  0xde   : > { %v276_v28 = vsel %vm229_vm0, %v273_v12, %v275_v27  ;;  %v280_v33 = vadd.f32 %v275_v27, %v265_v25 }
  0xdf   : > { %854 = vrot.lane.b32.xlu1 %v850_v20, %s2261_s3  ;;  %837 = vrot.lane.b32.xlu0 %v835_v22, %s2262_s23  ;;  %v279_v35 = vadd.f32 %v276_v28, %v264_v26 }
  0xe1   : > { %v301_v34 = vpop.permute.xlu1 %300  ;;  %v290_v36 = vpop.permute.xlu0 %289 }
  0xe2   : > { %v291_v37 = vsel %vm245_vm1, %v288_v24, %v290_v36  ;;  %v295_v38 = vadd.f32 %v290_v36, %v280_v33  ;;  %v410_v24 = vstv %s1907_s6  ;;  %s1954_s6 = sld [smem:[#allocation7 + $0x3b]] }
  0xe3   : > { %869 = vrot.lane.b32.xlu1 %v865_v29, %s2260_s17  ;;  %v294_v41 = vadd.f32 %v291_v37, %v279_v35  ;;  %856 = vrot.lane.b32.xlu0 %v851_v31, %s2261_s3  ;;  %v412_v27 = vmul.f32 %v410_v24, %v2449_v2  ;;  %v396_v29 = vstv %s1906_s7  ;;  %v411_v32 = vmul.f32 %v410_v24, %v2446_v1  ;;  %s2707_s7 = sld [smem:[#allocation7 + $0x3e]] }
  0xe4   : > { %v304_v45 = vadd.f32 %v301_v34, %v295_v38 }
  0xe5   : > { %v320_v46 = vpop.permute.xlu1 %319  ;;  %v303_v47 = vadd.f32 %v301_v34, %v294_v41  ;;  %v318_v48 = vpop.permute.xlu0 %317 }
  0xe6   : > { %v310_v49 = vadd.f32 %v308_v39, %v304_v45  ;;  %v321_v55 = vsel %vm229_vm0, %v318_v48, %v320_v46 }
  0xe7   : > { %882 = vrot.lane.b32.xlu1 %v880_v40, %s2262_s23  ;;  %v309_v51 = vadd.f32 %v307_v42, %v303_v47  ;;  %871 = vrot.lane.b32.xlu0 %v866_v43, %s2260_s17  ;;  %v455_v42 = vstv %s1911_s8  ;;  %s1958_s8 = sld [smem:[#allocation7 + $0x3f]] }
  0xe8   : > { %v325_v54 = vadd.f32 %v320_v46, %v310_v49  ;;  %v457_v47 = vmul.f32 %v455_v42, %v2457_v4  ;;  %v456_v48 = vmul.f32 %v455_v42, %v2454_v3 }
  0xe9   : > { %v335_v56 = vpop.permute.xlu1 %334  ;;  %v324_v57 = vadd.f32 %v321_v55, %v309_v51  ;;  %v333_v58 = vpop.permute.xlu0 %332 }
  0xea   : > { %v336_v60 = vsel %vm245_vm1, %v333_v58, %v335_v56  ;;  %v340_v0 = vadd.f32 %v335_v56, %v325_v54 }
  0xeb   : > { %901 = vrot.lane.b32.xlu1 %v896_v50, %s2261_s3  ;;  %v339_v62 = vadd.f32 %v336_v60, %v324_v57  ;;  %899 = vrot.lane.b32.xlu0 %v895_v52, %s2261_s3  ;;  %v500_v57 = vstv %s1915_s20  ;;  %s1943_s20 = sld [smem:[#allocation7 + $0x30]] }
  0xed   : > { %v363_v7 = vpop.permute.xlu1 %362  ;;  %v346_v12 = vpop.permute.xlu0 %345 }
  0xee   : > { %v348_v13 = vadd.f32 %v346_v12, %v339_v62  ;;  %v349_v14 = vadd.f32 %v346_v12, %v340_v0  ;;  %v502_v0 = vmul.f32 %v500_v57, %v2461_v5 }
  0xef   : > { %916 = vrot.lane.b32.xlu1 %v911_v61, %s2260_s17  ;;  %914 = vrot.lane.b32.xlu0 %v910_v63, %s2260_s17 }
  0xf0   : > { %v355_v16 = vadd.f32 %v353_v10, %v349_v14  ;;  %v354_v17 = vadd.f32 %v352_v11, %v348_v13  ;;  %v501_v10 = vmul.f32 %v500_v57, %v2463_v6 }
  0xf1   : > { %v378_v15 = vpop.permute.xlu1 %377  ;;  %v365_v18 = vpop.permute.xlu0 %364 }
  0xf2   : > { %v366_v19 = vsel %vm229_vm0, %v363_v7, %v365_v18  ;;  %v370_v20 = vadd.f32 %v365_v18, %v355_v16 }
  0xf3   : > { %v369_v22 = vadd.f32 %v366_v19, %v354_v17 }
  0xf5   : > { %v391_v21 = vpop.permute.xlu1 %390  ;;  %v380_v23 = vpop.permute.xlu0 %379 }
  0xf6   : > { %v381_v25 = vsel %vm245_vm1, %v378_v15, %v380_v23  ;;  %v385_v26 = vadd.f32 %v380_v23, %v370_v20 }
  0xf7   : > { %v384_v28 = vadd.f32 %v381_v25, %v369_v22  ;;  %v545_v22 = vstv %s1919_s18  ;;  %s1947_s18 = sld [smem:[#allocation7 + $0x34]] }
  0xf8   : > { %v394_v30 = vadd.f32 %v391_v21, %v385_v26 }
  0xf9   : > { %v424_v31 = vpop.permute.xlu1 %423  ;;  %v422_v33 = vpop.permute.xlu0 %421  ;;  %v393_v34 = vadd.f32 %v391_v21, %v384_v28  ;;  %v546_v28 = vmul.f32 %v545_v22, %v2468_v8 }
  0xfa   : > { %v429_v35 = vadd.f32 %v424_v31, %v412_v27  ;;  %v425_v36 = vsel %vm229_vm0, %v422_v33, %v424_v31  ;;  %v398_v37 = vadd.f32 %v396_v29, %v394_v30  ;;  %v547_v27 = vmul.f32 %v545_v22, %v2471_v9 }
  0xfb   : > { %v397_v38 = vadd.f32 %v396_v29, %v393_v34  ;;  %v428_v40 = vadd.f32 %v425_v36, %v411_v32 }
  0xfc   : > { %403 = vrot.lane.b32.xlu1 %v398_v37, %s2263_s26 }
  0xfd   : > { %v439_v39 = vpop.permute.xlu1 %438  ;;  %401 = vrot.lane.b32.xlu0 %v397_v38, %s2263_s26  ;;  %v437_v41 = vpop.permute.xlu0 %436 }
  0xfe   : > { %v444_v43 = vadd.f32 %v439_v39, %v429_v35  ;;  %v440_v44 = vsel %vm245_vm1, %v437_v41, %v439_v39  ;;  %v604_v41 = vstv %s1925_s19  ;;  %s1951_s19 = sld [smem:[#allocation7 + $0x38]] }
  0xff   : > { %v443_v45 = vadd.f32 %v440_v44, %v428_v40  ;;  %v606_v44 = vmul.f32 %v604_v41, %v2449_v2 }
 0x101   : > { %v467_v46 = vpop.permute.xlu1 %466  ;;  %v450_v49 = vpop.permute.xlu0 %449 }
 0x102   : > { %v452_v50 = vadd.f32 %v450_v49, %v443_v45  ;;  %v453_v51 = vadd.f32 %v450_v49, %v444_v43  ;;  %v605_v49 = vmul.f32 %v604_v41, %v2446_v1 }
 0x104   : > { %v459_v53 = vadd.f32 %v457_v47, %v453_v51  ;;  %v458_v54 = vadd.f32 %v456_v48, %v452_v50 }
 0x105   : > { %v482_v52 = vpop.permute.xlu1 %481  ;;  %v469_v55 = vpop.permute.xlu0 %468 }
 0x106   : > { %v470_v56 = vsel %vm229_vm0, %v467_v46, %v469_v55  ;;  %v474_v58 = vadd.f32 %v469_v55, %v459_v53  ;;  %v590_v46 = vstv %s1923_s24  ;;  %s1955_s24 = sld [smem:[#allocation7 + $0x3c]] }
 0x107   : > { %v473_v60 = vadd.f32 %v470_v56, %v458_v54 }
 0x109   : > { %v495_v59 = vpop.permute.xlu1 %494  ;;  %v484_v61 = vpop.permute.xlu0 %483 }
 0x10a   : > { %v485_v62 = vsel %vm245_vm1, %v482_v52, %v484_v61  ;;  %v489_v63 = vadd.f32 %v484_v61, %v474_v58 }
 0x10b   : > { %v488_v7 = vadd.f32 %v485_v62, %v473_v60 }
 0x10c   : > { %v498_v11 = vadd.f32 %v495_v59, %v489_v63 }
 0x10d   : > { %v514_v12 = vpop.permute.xlu1 %513  ;;  %v497_v13 = vadd.f32 %v495_v59, %v488_v7  ;;  %v512_v14 = vpop.permute.xlu0 %511  ;;  %v649_v59 = vstv %s1929_s28  ;;  %s1959_s28 = sld [smem:[#allocation7 + $0x83]] }
 0x10e   : > { %v504_v15 = vadd.f32 %v502_v0, %v498_v11  ;;  %v515_v18 = vsel %vm229_vm0, %v512_v14, %v514_v12  ;;  %v651_v0 = vmul.f32 %v649_v59, %v2457_v4  ;;  %v650_v7 = vmul.f32 %v649_v59, %v2454_v3 }
 0x10f   : > { %v503_v16 = vadd.f32 %v501_v10, %v497_v13 }
 0x110   : > { %v519_v17 = vadd.f32 %v514_v12, %v504_v15 }
 0x111   : > { %v529_v19 = vpop.permute.xlu1 %528  ;;  %v518_v20 = vadd.f32 %v515_v18, %v503_v16  ;;  %v527_v21 = vpop.permute.xlu0 %526  ;;  %v694_v18 = vstv %s1933_s15  ;;  %s1962_s15 = sld [smem:[#allocation7 + $0x41]] }
 0x112   : > { %v530_v23 = vsel %vm245_vm1, %v527_v21, %v529_v19  ;;  %v534_v25 = vadd.f32 %v529_v19, %v519_v17 }
 0x113   : > { %v533_v24 = vadd.f32 %v530_v23, %v518_v20 }
 0x115   : > { %v557_v26 = vpop.permute.xlu1 %556  ;;  %v540_v29 = vpop.permute.xlu0 %539 }
 0x116   : > { %v542_v30 = vadd.f32 %v540_v29, %v533_v24  ;;  %v543_v31 = vadd.f32 %v540_v29, %v534_v25  ;;  %v696_v25 = vmul.f32 %v694_v18, %v2461_v5 }
 0x118   : > { %v549_v33 = vadd.f32 %v547_v27, %v543_v31  ;;  %v548_v34 = vadd.f32 %v546_v28, %v542_v30  ;;  %v695_v27 = vmul.f32 %v694_v18, %v2463_v6  ;;  %v954_v18 = vstv %s2707_s7  ;;  %s1968_s7 = sld [smem:[#allocation7 + $0x47]] }
 0x119   : > { %v572_v32 = vpop.permute.xlu1 %571  ;;  %v559_v35 = vpop.permute.xlu0 %558 }
 0x11a   : > { %v560_v36 = vsel %vm229_vm0, %v557_v26, %v559_v35  ;;  %v564_v37 = vadd.f32 %v559_v35, %v549_v33 }
 0x11b   : > { %v563_v39 = vadd.f32 %v560_v36, %v548_v34 }
 0x11d   : > { %v585_v38 = vpop.permute.xlu1 %584  ;;  %v574_v40 = vpop.permute.xlu0 %573 }
 0x11e   : > { %v575_v42 = vsel %vm245_vm1, %v572_v32, %v574_v40  ;;  %v579_v43 = vadd.f32 %v574_v40, %v564_v37 }
 0x11f   : > { %v578_v45 = vadd.f32 %v575_v42, %v563_v39  ;;  %v739_v39 = vstv %s1937_s16  ;;  %s1963_s16 = sld [smem:[#allocation7 + $0x42]] }
 0x120   : > { %v588_v47 = vadd.f32 %v585_v38, %v579_v43 }
 0x121   : > { %v618_v48 = vpop.permute.xlu1 %617  ;;  %v616_v50 = vpop.permute.xlu0 %615  ;;  %v587_v51 = vadd.f32 %v585_v38, %v578_v45  ;;  %v740_v45 = vmul.f32 %v739_v39, %v2468_v8 }
 0x122   : > { %v623_v52 = vadd.f32 %v618_v48, %v606_v44  ;;  %v619_v53 = vsel %vm229_vm0, %v616_v50, %v618_v48  ;;  %v592_v54 = vadd.f32 %v590_v46, %v588_v47  ;;  %v741_v44 = vmul.f32 %v739_v39, %v2471_v9 }
 0x123   : > { %v591_v55 = vadd.f32 %v590_v46, %v587_v51  ;;  %v622_v57 = vadd.f32 %v619_v53, %v605_v49 }
 0x124   : > { %597 = vrot.lane.b32.xlu1 %v592_v54, %s2263_s26 }
 0x125   : > { %v633_v56 = vpop.permute.xlu1 %632  ;;  %595 = vrot.lane.b32.xlu0 %v591_v55, %s2263_s26  ;;  %v631_v58 = vpop.permute.xlu0 %630 }
 0x126   : > { %v638_v60 = vadd.f32 %v633_v56, %v623_v52  ;;  %v634_v61 = vsel %vm245_vm1, %v631_v58, %v633_v56 }
 0x127   : > { %v637_v62 = vadd.f32 %v634_v61, %v622_v57  ;;  %v784_v61 = vstv %s1941_s30  ;;  %s1966_s30 = sld [smem:[#allocation7 + $0x45]] }
 0x129   : > { %v661_v63 = vpop.permute.xlu1 %660  ;;  %v644_v10 = vpop.permute.xlu0 %643 }
 0x12a   : > { %v646_v11 = vadd.f32 %v644_v10, %v637_v62  ;;  %v647_v12 = vadd.f32 %v644_v10, %v638_v60  ;;  %v939_v10 = vstv %s2704_s4  ;;  %s1964_s4 = sld [smem:[#allocation7 + $0x43]] }
 0x12c   : > { %v653_v14 = vadd.f32 %v651_v0, %v647_v12  ;;  %v652_v15 = vadd.f32 %v650_v7, %v646_v11  ;;  %v924_v12 = vstv %s1954_s6  ;;  %s1967_s6 = sld [smem:[#allocation7 + $0x46]] }
 0x12d   : > { %v676_v13 = vpop.permute.xlu1 %675  ;;  %v663_v16 = vpop.permute.xlu0 %662 }
 0x12e   : > { %v664_v17 = vsel %vm229_vm0, %v661_v63, %v663_v16  ;;  %v668_v19 = vadd.f32 %v663_v16, %v653_v14  ;;  %v940_v14 = vmul.f32 %v939_v10, %v2468_v8  ;;  %v925_v16 = vmul.f32 %v924_v12, %v2461_v5 }
 0x12f   : > { %v667_v21 = vadd.f32 %v664_v17, %v652_v15 }
 0x131   : > { %v689_v20 = vpop.permute.xlu1 %688  ;;  %v678_v22 = vpop.permute.xlu0 %677 }
 0x132   : > { %v679_v23 = vsel %vm245_vm1, %v676_v13, %v678_v22  ;;  %v683_v24 = vadd.f32 %v678_v22, %v668_v19  ;;  %v955_v19 = vmul.f32 %v954_v18, %v2468_v8 }
 0x133   : > { %v682_v26 = vadd.f32 %v679_v23, %v667_v21  ;;  %v941_v21 = vmul.f32 %v939_v10, %v2471_v9  ;;  %v969_v23 = vstv %s1958_s8  ;;  %s1970_s8 = sld [smem:[#allocation7 + $0x49]] }
 0x134   : > { %v692_v28 = vadd.f32 %v689_v20, %v683_v24  ;;  %v970_v24 = vmul.f32 %v969_v23, %v2471_v9 }
 0x135   : > { %v708_v29 = vpop.permute.xlu1 %707  ;;  %v691_v30 = vadd.f32 %v689_v20, %v682_v26  ;;  %v706_v31 = vpop.permute.xlu0 %705 }
 0x136   : > { %v698_v32 = vadd.f32 %v696_v25, %v692_v28  ;;  %v709_v35 = vsel %vm229_vm0, %v706_v31, %v708_v29  ;;  %v956_v25 = vmul.f32 %v954_v18, %v2471_v9 }
 0x137   : > { %v697_v33 = vadd.f32 %v695_v27, %v691_v30 }
 0x138   : > { %v713_v34 = vadd.f32 %v708_v29, %v698_v32 }
 0x139   : > { %v723_v36 = vpop.permute.xlu1 %722  ;;  %v712_v37 = vadd.f32 %v709_v35, %v697_v33  ;;  %v721_v38 = vpop.permute.xlu0 %720 }
 0x13a   : > { %v724_v40 = vsel %vm245_vm1, %v721_v38, %v723_v36  ;;  %v728_v42 = vadd.f32 %v723_v36, %v713_v34  ;;  %v798_v38 = vstv %s1943_s20  ;;  %s1980_s20 = sld [smem:[#allocation7 + $0x51]] }
 0x13b   : > { %v727_v41 = vadd.f32 %v724_v40, %v712_v37 }
 0x13d   : > { %v751_v43 = vpop.permute.xlu1 %750  ;;  %v734_v46 = vpop.permute.xlu0 %733 }
 0x13e   : > { %v736_v47 = vadd.f32 %v734_v46, %v727_v41  ;;  %v737_v48 = vadd.f32 %v734_v46, %v728_v42  ;;  %v800_v41 = vmul.f32 %v798_v38, %v2449_v2  ;;  %v799_v42 = vmul.f32 %v798_v38, %v2446_v1 }
 0x140   : > { %v743_v49 = vadd.f32 %v741_v44, %v737_v48  ;;  %v742_v51 = vadd.f32 %v740_v45, %v736_v47 }
 0x141   : > { %v766_v50 = vpop.permute.xlu1 %765  ;;  %v753_v52 = vpop.permute.xlu0 %752 }
 0x142   : > { %v754_v53 = vsel %vm229_vm0, %v751_v43, %v753_v52  ;;  %v758_v54 = vadd.f32 %v753_v52, %v743_v49  ;;  %v843_v49 = vstv %s1947_s18  ;;  %s2764_s18 = sld [smem:[#allocation7 + $0x4a]] }
 0x143   : > { %v757_v56 = vadd.f32 %v754_v53, %v742_v51  ;;  %v845_v53 = vmul.f32 %v843_v49, %v2457_v4 }
 0x145   : > { %v779_v55 = vpop.permute.xlu1 %778  ;;  %v768_v57 = vpop.permute.xlu0 %767 }
 0x146   : > { %v769_v58 = vsel %vm245_vm1, %v766_v50, %v768_v57  ;;  %v773_v59 = vadd.f32 %v768_v57, %v758_v54  ;;  %v844_v50 = vmul.f32 %v843_v49, %v2454_v3  ;;  %v1013_v49 = vstv %s1963_s16  ;;  %s2017_s16 = sld [smem:[#allocation7 + $0x72]] }
 0x147   : > { %v772_v60 = vadd.f32 %v769_v58, %v757_v56 }
 0x148   : > { %v782_v62 = vadd.f32 %v779_v55, %v773_v59 }
 0x149   : > { %v812_v63 = vpop.permute.xlu1 %811  ;;  %v781_v0 = vadd.f32 %v779_v55, %v772_v60  ;;  %v810_v7 = vpop.permute.xlu0 %809 }
 0x14a   : > { %v786_v11 = vadd.f32 %v784_v61, %v782_v62  ;;  %v813_v43 = vsel %vm229_vm0, %v810_v7, %v812_v63  ;;  %v817_v44 = vadd.f32 %v812_v63, %v800_v41  ;;  %v888_v62 = vstv %s1951_s19  ;;  %s1998_s19 = sld [smem:[#allocation7 + $0x61]] }
 0x14b   : > { %v785_v13 = vadd.f32 %v784_v61, %v781_v0  ;;  %v816_v45 = vadd.f32 %v813_v43, %v799_v42  ;;  %v890_v7 = vmul.f32 %v888_v62, %v2461_v5  ;;  %v889_v10 = vmul.f32 %v888_v62, %v2463_v6 }
 0x14c   : > { %791 = vrot.lane.b32.xlu1 %v786_v11, %s2263_s26  ;;  %v978_v41 = vstv %s1959_s28  ;;  %v1088_v62 = vstv %s1970_s8  ;;  %s1981_s28 = sld [smem:[#allocation7 + $0x52]]  ;;  %s2002_s8 = sld [smem:[#allocation7 + $0x65]] }
 0x14d   : > { %v827_v15 = vpop.permute.xlu1 %826  ;;  %789 = vrot.lane.b32.xlu0 %v785_v13, %s2263_s26  ;;  %v825_v17 = vpop.permute.xlu0 %824 }
 0x14e   : > { %v828_v46 = vsel %vm245_vm1, %v825_v17, %v827_v15  ;;  %v832_v47 = vadd.f32 %v827_v15, %v817_v44  ;;  %v998_v44 = vstv %s1962_s15  ;;  %s1999_s15 = sld [smem:[#allocation7 + $0x62]] }
 0x14f   : > { %v831_v48 = vadd.f32 %v828_v46, %v816_v45 }
 0x150   : > { %944 = vrot.lane.b32.xlu1 %v940_v14, %s2261_s3 }
 0x151   : > { %v855_v20 = vpop.permute.xlu1 %854  ;;  %927 = vrot.lane.b32.xlu0 %v925_v16, %s2262_s23  ;;  %v838_v22 = vpop.permute.xlu0 %837 }
 0x152   : > { %v840_v51 = vadd.f32 %v838_v22, %v831_v48  ;;  %v841_v52 = vadd.f32 %v838_v22, %v832_v47  ;;  %v1000_v47 = vmul.f32 %v998_v44, %v2449_v2  ;;  %v999_v48 = vmul.f32 %v998_v44, %v2446_v1 }
 0x154   : > { %959 = vrot.lane.b32.xlu1 %v955_v19, %s2260_s17  ;;  %v846_v54 = vadd.f32 %v844_v50, %v840_v51  ;;  %v847_v55 = vadd.f32 %v845_v53, %v841_v52  ;;  %v933_v19 = vstv %s1955_s24  ;;  %v1015_v50 = vmul.f32 %v1013_v49, %v2449_v2  ;;  %s2016_s24 = sld [smem:[#allocation7 + $0x71]] }
 0x155   : > { %946 = vrot.lane.b32.xlu0 %v941_v21, %s2261_s3  ;;  %v870_v26 = vpop.permute.xlu1 %869  ;;  %v857_v27 = vpop.permute.xlu0 %856  ;;  %v1014_v51 = vmul.f32 %v1013_v49, %v2446_v1  ;;  %v1043_v52 = vstv %s1966_s30  ;;  %v1028_v53 = vstv %s1964_s4  ;;  %s1982_s30 = sld [smem:[#allocation7 + $0x53]] }
 0x156   : > { %v858_v56 = vsel %vm229_vm0, %v855_v20, %v857_v27  ;;  %v862_v58 = vadd.f32 %v857_v27, %v847_v55  ;;  %v1029_v55 = vmul.f32 %v1028_v53, %v2449_v2  ;;  %s2018_s4 = sld [smem:[#allocation7 + $0x73]] }
 0x157   : > { %v861_v57 = vadd.f32 %v858_v56, %v846_v54  ;;  %v1044_v54 = vmul.f32 %v1043_v52, %v2454_v3  ;;  %v1058_v56 = vstv %s1967_s6  ;;  %s2000_s6 = sld [smem:[#allocation7 + $0x63]] }
 0x158   : > { %972 = vrot.lane.b32.xlu1 %v970_v24, %s2262_s23  ;;  %v935_v24 = vmul.f32 %v933_v19, %v2471_v9 }
 0x159   : > { %961 = vrot.lane.b32.xlu0 %v956_v25, %s2260_s17  ;;  %v883_v28 = vpop.permute.xlu1 %882  ;;  %v872_v29 = vpop.permute.xlu0 %871  ;;  %v934_v25 = vmul.f32 %v933_v19, %v2468_v8  ;;  %v1207_v19 = vstv %s1981_s28  ;;  %s2021_s28 = sld [smem:[#allocation7 + $0x76]] }
 0x15a   : > { %v873_v59 = vsel %vm245_vm1, %v870_v26, %v872_v29  ;;  %v877_v61 = vadd.f32 %v872_v29, %v862_v58  ;;  %v1045_v58 = vmul.f32 %v1043_v52, %v2457_v4 }
 0x15b   : > { %v876_v60 = vadd.f32 %v873_v59, %v861_v57  ;;  %v1059_v57 = vmul.f32 %v1058_v56, %v2454_v3  ;;  %v1073_v59 = vstv %s1968_s7  ;;  %s1984_s7 = sld [smem:[#allocation7 + $0x55]] }
 0x15c   : > { %v886_v0 = vadd.f32 %v883_v28, %v877_v61  ;;  %v1060_v61 = vmul.f32 %v1058_v56, %v2457_v4 }
 0x15d   : > { %v902_v30 = vpop.permute.xlu1 %901  ;;  %v900_v31 = vpop.permute.xlu0 %899  ;;  %v885_v63 = vadd.f32 %v883_v28, %v876_v60  ;;  %v1074_v60 = vmul.f32 %v1073_v59, %v2457_v4 }
 0x15e   : > { %v892_v11 = vadd.f32 %v890_v7, %v886_v0  ;;  %v903_v13 = vsel %vm229_vm0, %v900_v31, %v902_v30  ;;  %v1089_v0 = vmul.f32 %v1088_v62, %v2463_v6  ;;  %v1192_v7 = vstv %s1980_s20  ;;  %s2020_s20 = sld [smem:[#allocation7 + $0x75]] }
 0x15f   : > { %v891_v12 = vadd.f32 %v889_v10, %v885_v63  ;;  %v1090_v63 = vmul.f32 %v1088_v62, %v2461_v5  ;;  %v1103_v10 = vstv %s2764_s18  ;;  %s2026_s18 = sld [smem:[#allocation7 + $0x7b]] }
 0x160   : > { %v907_v14 = vadd.f32 %v902_v30, %v892_v11  ;;  %v1193_v11 = vmul.f32 %v1192_v7, %v2446_v1 }
 0x161   : > { %v917_v32 = vpop.permute.xlu1 %916  ;;  %v915_v33 = vpop.permute.xlu0 %914  ;;  %v906_v15 = vadd.f32 %v903_v13, %v891_v12  ;;  %v1104_v12 = vmul.f32 %v1103_v10, %v2463_v6  ;;  %v1386_v13 = vstv %s1998_s19  ;;  %s1985_s19 = sld [smem:[#allocation7 + $0x56]] }
 0x162   : > { %v918_v17 = vsel %vm245_vm1, %v915_v33, %v917_v32  ;;  %v922_v21 = vadd.f32 %v917_v32, %v907_v14  ;;  %v1387_v14 = vmul.f32 %v1386_v13, %v2446_v1 }
 0x163   : > { %v921_v22 = vadd.f32 %v918_v17, %v906_v15  ;;  %v1194_v15 = vmul.f32 %v1192_v7, %v2449_v2 }
 0x167   : > { %v1252_v44 = vstv %s1985_s19  ;;  %s2025_s19 = sld [smem:[#allocation7 + $0x7a]] }
 0x16e   : > { %v404_v34 = vpop.permute.xlu1 %403 }
 0x16f   : > { %v402_v35 = vpop.permute.xlu0 %401 }
 0x170   : > { %v406_v36 = vsel %vm405_vm2, %v402_v35, %v404_v34 }
 0x171   : > { %408 = vst [vmem:[%s2443_s27] sm:$0x3] %v406_v36 }
 0x196   : > { %v598_v37 = vpop.permute.xlu1 %597 }
 0x197   : > { %v596_v39 = vpop.permute.xlu0 %595 }
 0x198   : > { %v599_v40 = vsel %vm405_vm2, %v596_v39, %v598_v37 }
 0x199   : > { %1924 = vst [vmem:[%s2443_s27 + $0x2] sm:$0x3] %v599_v40 }
 0x1be   : > { %v792_v16 = vpop.permute.xlu1 %791 }
 0x1bf   : > { %v790_v18 = vpop.permute.xlu0 %789 }
 0x1c0   : > { %v793_v20 = vsel %vm405_vm2, %v790_v18, %v792_v16  ;;  %v1580_v16 = vstv %s2016_s24  ;;  %v1388_v18 = vmul.f32 %v1386_v13, %v2449_v2  ;;  %s2003_s24 = sld [smem:[#allocation7 + $0x66]] }
 0x1c1   : > { %1942 = vst [vmem:[%s2443_s27 + $0x4] sm:$0x3] %v793_v20  ;;  %v1581_v17 = vmul.f32 %v1580_v16, %v2446_v1  ;;  %v1208_v20 = vmul.f32 %v1207_v19, %v2446_v1 }
 0x1c2   : > { %v945_v23 = vpop.permute.xlu1 %944 }
 0x1c3   : > { %v928_v26 = vpop.permute.xlu0 %927 }
 0x1c4   : > { %v930_v27 = vadd.f32 %v928_v26, %v921_v22  ;;  %v931_v28 = vadd.f32 %v928_v26, %v922_v21  ;;  %v1582_v21 = vmul.f32 %v1580_v16, %v2449_v2  ;;  %v1401_v22 = vstv %s1999_s15  ;;  %s2004_s15 = sld [smem:[#allocation7 + $0x67]] }
 0x1c6   : > { %v937_v29 = vadd.f32 %v935_v24, %v931_v28  ;;  %v960_v30 = vpop.permute.xlu1 %959  ;;  %v936_v31 = vadd.f32 %v934_v25, %v930_v27  ;;  %v1209_v24 = vmul.f32 %v1207_v19, %v2449_v2  ;;  %v1595_v25 = vstv %s2017_s16  ;;  %s1986_s16 = sld [smem:[#allocation7 + $0x57]] }
 0x1c7   : > { %v947_v33 = vpop.permute.xlu0 %946  ;;  %v1596_v26 = vmul.f32 %v1595_v25, %v2446_v1  ;;  %v1403_v27 = vmul.f32 %v1401_v22, %v2449_v2  ;;  %v1222_v28 = vstv %s1982_s30  ;;  %s1988_s30 = sld [smem:[#allocation7 + $0x59]]  ;;  %v1685_v19 = vstv %s2025_s19  ;;  %s2908_s19 = sld [smem:[#allocation7 + $0x4e]] }
 0x1c8   : > { %v948_v34 = vsel %vm229_vm0, %v945_v23, %v947_v33  ;;  %v952_v35 = vadd.f32 %v947_v33, %v937_v29  ;;  %v1402_v23 = vmul.f32 %v1401_v22, %v2446_v1  ;;  %v1223_v29 = vmul.f32 %v1222_v28, %v2449_v2 }
 0x1c9   : > { %v951_v36 = vadd.f32 %v948_v34, %v936_v31  ;;  %v1610_v31 = vstv %s2018_s4  ;;  %v1416_v33 = vstv %s2000_s6  ;;  %s2022_s4 = sld [smem:[#allocation7 + $0x77]]  ;;  %s2006_s6 = sld [smem:[#allocation7 + $0x69]] }
 0x1ca   : > { %v973_v37 = vpop.permute.xlu1 %972  ;;  %v1611_v34 = vmul.f32 %v1610_v31, %v2449_v2  ;;  %v1461_v53 = vstv %s2004_s15  ;;  %s2863_s15 = sld [smem:[#allocation7 + $0x40]] }
 0x1cb   : > { %v962_v32 = vpop.permute.xlu0 %961 }
 0x1cc   : > { %v963_v38 = vsel %vm245_vm1, %v960_v30, %v962_v32  ;;  %v967_v39 = vadd.f32 %v962_v32, %v952_v35  ;;  %v1597_v30 = vmul.f32 %v1595_v25, %v2449_v2  ;;  %v1417_v35 = vmul.f32 %v1416_v33, %v2449_v2 }
 0x1cd   : > { %v966_v40 = vadd.f32 %v963_v38, %v951_v36  ;;  %v1237_v36 = vstv %s1984_s7  ;;  %v1431_v38 = vstv %s2002_s8  ;;  %s2024_s7 = sld [smem:[#allocation7 + $0x79]]  ;;  %s1989_s8 = sld [smem:[#allocation7 + $0x5a]] }
 0x1ce   : > { %v976_v42 = vadd.f32 %v973_v37, %v967_v39  ;;  %v1239_v32 = vmul.f32 %v1237_v36, %v2457_v4  ;;  %v1433_v39 = vmul.f32 %v1431_v38, %v2457_v4 }
 0x1cf   : > { %v975_v43 = vadd.f32 %v973_v37, %v966_v40  ;;  %v1238_v37 = vmul.f32 %v1237_v36, %v2454_v3  ;;  %v1432_v40 = vmul.f32 %v1431_v38, %v2454_v3 }
 0x1d0   : > { %v980_v45 = vadd.f32 %v978_v41, %v976_v42  ;;  %v992_v28 = vstv %s2863_s15  ;;  %s1976_s15 = sld [smem:[#allocation7 + $0x4f]] }
 0x1d1   : > { %v979_v46 = vadd.f32 %v978_v41, %v975_v43  ;;  %v1625_v41 = vstv %s2020_s20  ;;  %s2007_s20 = sld [smem:[#allocation7 + $0x6a]]  ;;  %v994_v31 = vmul.f32 %v992_v28, %v2449_v2  ;;  %v993_v38 = vmul.f32 %v992_v28, %v2446_v1 }
 0x1d2   : > { %985 = vrot.lane.b32.xlu1 %v980_v45, %s2263_s26  ;;  %v1627_v42 = vmul.f32 %v1625_v41, %v2457_v4  ;;  %v1626_v43 = vmul.f32 %v1625_v41, %v2454_v3  ;;  %v1254_v45 = vmul.f32 %v1252_v44, %v2457_v4 }
 0x1d3   : > { %983 = vrot.lane.b32.xlu0 %v979_v46, %s2263_s26  ;;  %v1253_v46 = vmul.f32 %v1252_v44, %v2454_v3 }
 0x1d6   : > { %1005 = vrot.lane.b32.xlu1 %v1000_v47, %s2261_s3  ;;  %v1446_v47 = vstv %s2003_s24  ;;  %s1990_s24 = sld [smem:[#allocation7 + $0x5b]] }
 0x1d7   : > { %1003 = vrot.lane.b32.xlu0 %v999_v48, %s2261_s3  ;;  %v1448_v48 = vmul.f32 %v1446_v47, %v2457_v4  ;;  %v1447_v49 = vmul.f32 %v1446_v47, %v2454_v3 }
 0x1da   : > { %1020 = vrot.lane.b32.xlu1 %v1015_v50, %s2260_s17  ;;  %v1640_v50 = vstv %s2021_s28  ;;  %s1972_s28 = sld [smem:[#allocation7 + $0x4b]] }
 0x1db   : > { %1018 = vrot.lane.b32.xlu0 %v1014_v51, %s2260_s17  ;;  %v1642_v51 = vmul.f32 %v1640_v50, %v2457_v4  ;;  %v1641_v52 = vmul.f32 %v1640_v50, %v2454_v3 }
 0x1dc   : > { %v1312_v22 = vstv %s1990_s24  ;;  %s2917_s24 = sld [smem:[#allocation7 + $0x5e]] }
 0x1de   : > { %1048 = vrot.lane.b32.xlu1 %v1044_v54, %s2261_s3  ;;  %v1267_v54 = vstv %s1986_s16  ;;  %s2008_s16 = sld [smem:[#allocation7 + $0x6b]] }
 0x1df   : > { %1031 = vrot.lane.b32.xlu0 %v1029_v55, %s2262_s23  ;;  %v1462_v55 = vmul.f32 %v1461_v53, %v2457_v4  ;;  %v1268_v56 = vmul.f32 %v1267_v54, %v2457_v4 }
 0x1e2   : > { %1063 = vrot.lane.b32.xlu1 %v1059_v57, %s2260_s17  ;;  %v1282_v57 = vstv %s1988_s30  ;;  %s2869_s30 = sld [smem:[#allocation7 + $0x4d]] }
 0x1e3   : > { %1050 = vrot.lane.b32.xlu0 %v1045_v58, %s2261_s3  ;;  %v1655_v58 = vstv %s2022_s4  ;;  %v1283_v59 = vmul.f32 %v1282_v57, %v2463_v6  ;;  %s2875_s4 = sld [smem:[#allocation7 + $0x5d]] }
 0x1e6   : > { %1076 = vrot.lane.b32.xlu1 %v1074_v60, %s2262_s23  ;;  %v1656_v60 = vmul.f32 %v1655_v58, %v2457_v4 }
 0x1e7   : > { %1065 = vrot.lane.b32.xlu0 %v1060_v61, %s2260_s17  ;;  %v1476_v61 = vstv %s2006_s6  ;;  %s2879_s6 = sld [smem:[#allocation7 + $0x44]] }
 0x1e8   : > { %v1477_v62 = vmul.f32 %v1476_v61, %v2463_v6  ;;  %v1133_v36 = vstv %s2869_s30  ;;  %s2959_s30 = sld [smem:[#allocation7 + $0x7f]] }
 0x1e9   : > { %v1135_v41 = vmul.f32 %v1133_v36, %v2471_v9 }
 0x1ea   : > { %1095 = vrot.lane.b32.xlu1 %v1090_v63, %s2261_s3  ;;  %v1284_v63 = vmul.f32 %v1282_v57, %v2461_v5 }
 0x1eb   : > { %1093 = vrot.lane.b32.xlu0 %v1089_v0, %s2261_s3  ;;  %v1670_v0 = vstv %s2024_s7  ;;  %s2888_s7 = sld [smem:[#allocation7 + $0x6d]] }
 0x1ec   : > { %v1671_v7 = vmul.f32 %v1670_v0, %v2463_v6  ;;  %v1672_v13 = vmul.f32 %v1670_v0, %v2461_v5 }
 0x1ee   : > { %1197 = vrot.lane.b32.xlu1 %v1193_v11, %s2261_s3  ;;  %v1478_v11 = vmul.f32 %v1476_v61, %v2461_v5 }
 0x1ef   : > { %1108 = vrot.lane.b32.xlu0 %v1104_v12, %s2260_s17  ;;  %v1105_v12 = vmul.f32 %v1103_v10, %v2461_v5 }
 0x1f1   : > { %v1521_v53 = vstv %s2888_s7  ;;  %s2972_s7 = sld [smem:[#allocation7 + $0x70]] }
 0x1f2   : > { %1391 = vrot.lane.b32.xlu1 %v1387_v14, %s2261_s3  ;;  %v1297_v14 = vstv %s1989_s8  ;;  %s2897_s8 = sld [smem:[#allocation7 + $0x7d]]  ;;  %v1522_v61 = vmul.f32 %v1521_v53, %v2468_v8 }
 0x1f3   : > { %1199 = vrot.lane.b32.xlu0 %v1194_v15, %s2261_s3  ;;  %v1299_v15 = vmul.f32 %v1297_v14, %v2461_v5  ;;  %v1298_v16 = vmul.f32 %v1297_v14, %v2463_v6 }
 0x1f6   : > { %1585 = vrot.lane.b32.xlu1 %v1581_v17, %s2261_s3  ;;  %v1491_v17 = vstv %s2007_s20  ;;  %s2906_s20 = sld [smem:[#allocation7 + $0x48]] }
 0x1f7   : > { %1393 = vrot.lane.b32.xlu0 %v1388_v18, %s2261_s3  ;;  %v1493_v10 = vmul.f32 %v1491_v17, %v2461_v5  ;;  %v1492_v18 = vmul.f32 %v1491_v17, %v2463_v6 }
 0x1fa   : > { %1212 = vrot.lane.b32.xlu1 %v1208_v20, %s2260_s17  ;;  %v1687_v20 = vmul.f32 %v1685_v19, %v2461_v5 }
 0x1fb   : > { %1587 = vrot.lane.b32.xlu0 %v1582_v21, %s2261_s3  ;;  %v1686_v21 = vmul.f32 %v1685_v19, %v2463_v6 }
 0x1fc   : > { %v1082_v17 = vstv %s2906_s20  ;;  %s2019_s20 = sld [smem:[#allocation7 + $0x74]] }
 0x1fe   : > { %1406 = vrot.lane.b32.xlu1 %v1402_v23, %s2260_s17  ;;  %v1118_v23 = vstv %s1972_s28  ;;  %s2926_s28 = sld [smem:[#allocation7 + $0x6e]] }
 0x1ff   : > { %1214 = vrot.lane.b32.xlu0 %v1209_v24, %s2260_s17  ;;  %v1313_v24 = vmul.f32 %v1312_v22, %v2461_v5  ;;  %v1119_v25 = vmul.f32 %v1118_v23, %v2461_v5  ;;  %v1084_v22 = vmul.f32 %v1082_v17, %v2461_v5 }
 0x202   : > { %1600 = vrot.lane.b32.xlu1 %v1596_v26, %s2260_s17  ;;  %v1700_v26 = vstv %s2026_s18  ;;  %s2936_s18 = sld [smem:[#allocation7 + $0x7e]] }
 0x203   : > { %1408 = vrot.lane.b32.xlu0 %v1403_v27, %s2260_s17 }
 0x206   : > { %1225 = vrot.lane.b32.xlu1 %v1223_v29, %s2262_s23  ;;  %v1506_v29 = vstv %s2008_s16  ;;  %s2952_s16 = sld [smem:[#allocation7 + $0x50]] }
 0x207   : > { %1602 = vrot.lane.b32.xlu0 %v1597_v30, %s2260_s17 }
 0x20a   : > { %1613 = vrot.lane.b32.xlu1 %v1611_v34, %s2262_s23  ;;  %v1701_v34 = vmul.f32 %v1700_v26, %v2461_v5 }
 0x20b   : > { %1419 = vrot.lane.b32.xlu0 %v1417_v35, %s2262_s23  ;;  %v1507_v35 = vmul.f32 %v1506_v29, %v2461_v5 }
 0x20e   : > { %1244 = vrot.lane.b32.xlu1 %v1239_v32, %s2261_s3 }
 0x20f   : > { %1242 = vrot.lane.b32.xlu0 %v1238_v37, %s2261_s3 }
 0x212   : > { %1438 = vrot.lane.b32.xlu1 %v1433_v39, %s2261_s3 }
 0x213   : > { %1436 = vrot.lane.b32.xlu0 %v1432_v40, %s2261_s3 }
 0x216   : > { %1632 = vrot.lane.b32.xlu1 %v1627_v42, %s2261_s3  ;;  %v1134_v42 = vmul.f32 %v1133_v36, %v2468_v8 }
 0x217   : > { %1630 = vrot.lane.b32.xlu0 %v1626_v43, %s2261_s3  ;;  %v1327_v43 = vstv %s2875_s4  ;;  %s2961_s4 = sld [smem:[#allocation7 + $0x6f]] }
 0x218   : > { %v1329_v50 = vmul.f32 %v1327_v43, %v2471_v9 }
 0x21a   : > { %1259 = vrot.lane.b32.xlu1 %v1254_v45, %s2260_s17 }
 0x21b   : > { %1257 = vrot.lane.b32.xlu0 %v1253_v46, %s2260_s17 }
 0x21e   : > { %1453 = vrot.lane.b32.xlu1 %v1448_v48, %s2260_s17  ;;  %v1037_v48 = vstv %s2879_s6  ;;  %s2963_s6 = sld [smem:[#allocation7 + $0x60]] }
 0x21f   : > { %1451 = vrot.lane.b32.xlu0 %v1447_v49, %s2260_s17 }
 0x222   : > { %1647 = vrot.lane.b32.xlu1 %v1642_v51, %s2260_s17 }
 0x223   : > { %1645 = vrot.lane.b32.xlu0 %v1641_v52, %s2260_s17  ;;  %v1328_v52 = vmul.f32 %v1327_v43, %v2468_v8 }
 0x226   : > { %1464 = vrot.lane.b32.xlu1 %v1462_v55, %s2262_s23  ;;  %v1038_v55 = vmul.f32 %v1037_v48, %v2454_v3 }
 0x227   : > { %1270 = vrot.lane.b32.xlu0 %v1268_v56, %s2262_s23  ;;  %v1039_v56 = vmul.f32 %v1037_v48, %v2457_v4 }
 0x22a   : > { %1287 = vrot.lane.b32.xlu1 %v1283_v59, %s2261_s3 }
 0x22b   : > { %1658 = vrot.lane.b32.xlu0 %v1656_v60, %s2262_s23  ;;  %v1523_v60 = vmul.f32 %v1521_v53, %v2471_v9  ;;  %v1186_v53 = vstv %s2952_s16  ;;  %s3106_s16 = sld [smem:[#allocation7 + $0x84]] }
 0x22e   : > { %1481 = vrot.lane.b32.xlu1 %v1477_v62, %s2261_s3  ;;  %v1715_v62 = vstv %s2897_s8  ;;  %s2998_s8 = sld [smem:[#allocation7 + $0x64]] }
 0x22f   : > { %1289 = vrot.lane.b32.xlu0 %v1284_v63, %s2261_s3  ;;  %v1717_v14 = vmul.f32 %v1715_v62, %v2471_v9 }
 0x232   : > { %1675 = vrot.lane.b32.xlu1 %v1671_v7, %s2261_s3 }
 0x233   : > { %1483 = vrot.lane.b32.xlu0 %v1478_v11, %s2261_s3 }
 0x236   : > { %1110 = vrot.lane.b32.xlu1 %v1105_v12, %s2260_s17 }
 0x237   : > { %1677 = vrot.lane.b32.xlu0 %v1672_v13, %s2261_s3 }
 0x23a   : > { %1304 = vrot.lane.b32.xlu1 %v1299_v15, %s2260_s17 }
 0x23b   : > { %1302 = vrot.lane.b32.xlu0 %v1298_v16, %s2260_s17  ;;  %v1716_v16 = vmul.f32 %v1715_v62, %v2468_v8  ;;  %v1187_v62 = vmul.f32 %v1186_v53, %v2446_v1 }
 0x23e   : > { %1498 = vrot.lane.b32.xlu1 %v1493_v10, %s2260_s17  ;;  %v1148_v10 = vstv %s2908_s19  ;;  %s2005_s19 = sld [smem:[#allocation7 + $0x68]] }
 0x23f   : > { %1496 = vrot.lane.b32.xlu0 %v1492_v18, %s2260_s17  ;;  %v1150_v23 = vmul.f32 %v1148_v10, %v2471_v9  ;;  %v1149_v26 = vmul.f32 %v1148_v10, %v2468_v8  ;;  %v1574_v10 = vstv %s2972_s7  ;;  %s2034_s7 = sshll.u32 %s2244_s12, 5  ;;  %s1768_s12 = scalar_lea.sflag [#allocation5], %s2428_s5 }
 0x242   : > { %1692 = vrot.lane.b32.xlu1 %v1687_v20, %s2260_s17 }
 0x243   : > { %1690 = vrot.lane.b32.xlu0 %v1686_v21, %s2260_s17 }
 0x244   : > { %v986_v27 = vpop.permute.xlu1 %985 }
 0x245   : > { %v984_v30 = vpop.permute.xlu0 %983 }
 0x246   : > { %v987_v33 = vsel %vm405_vm2, %v984_v30, %v986_v27  ;;  %1315 = vrot.lane.b32.xlu1 %v1313_v24, %s2262_s23  ;;  %v1342_v27 = vstv %s2917_s24  ;;  %s2023_s24 = sld [smem:[#allocation7 + $0x78]] }
 0x247   : > { %1960 = vst [vmem:[%s2443_s27 + $0x6] sm:$0x3] %v987_v33  ;;  %1121 = vrot.lane.b32.xlu0 %v1119_v25, %s2262_s23  ;;  %v1083_v25 = vmul.f32 %v1082_v17, %v2463_v6 }
 0x248   : > { %v1006_v32 = vpop.permute.xlu1 %1005 }
 0x249   : > { %v1011_v37 = vadd.f32 %v1006_v32, %v994_v31  ;;  %v1004_v39 = vpop.permute.xlu0 %1003 }
 0x24a   : > { %v1007_v40 = vsel %vm229_vm0, %v1004_v39, %v1006_v32  ;;  %1703 = vrot.lane.b32.xlu1 %v1701_v34, %s2262_s23  ;;  %v1343_v32 = vmul.f32 %v1342_v27, %v2468_v8 }
 0x24b   : > { %1509 = vrot.lane.b32.xlu0 %v1507_v35, %s2262_s23  ;;  %v1010_v45 = vadd.f32 %v1007_v40, %v993_v38  ;;  %v1344_v35 = vmul.f32 %v1342_v27, %v2471_v9 }
 0x24c   : > { %v1021_v44 = vpop.permute.xlu1 %1020 }
 0x24d   : > { %v1026_v46 = vadd.f32 %v1021_v44, %v1011_v37  ;;  %v1019_v47 = vpop.permute.xlu0 %1018  ;;  %v1536_v37 = vstv %s2926_s28  ;;  %s3057_s28 = sld [smem:[#allocation7 + $0x5c]] }
 0x24e   : > { %v1022_v49 = vsel %vm245_vm1, %v1019_v47, %v1021_v44  ;;  %1140 = vrot.lane.b32.xlu1 %v1135_v41, %s2261_s3  ;;  %v1537_v43 = vmul.f32 %v1536_v37, %v2468_v8  ;;  %v1730_v44 = vstv %s2936_s18  ;;  %s3061_s18 = sld [smem:[#allocation7 + $0x4c]] }
 0x24f   : > { %v1025_v51 = vadd.f32 %v1022_v49, %v1010_v45  ;;  %1138 = vrot.lane.b32.xlu0 %v1134_v42, %s2261_s3  ;;  %v1538_v42 = vmul.f32 %v1536_v37, %v2471_v9  ;;  %v1732_v48 = vmul.f32 %v1730_v44, %v2471_v9  ;;  %v1731_v49 = vmul.f32 %v1730_v44, %v2468_v8 }
 0x250   : > { %v1049_v54 = vpop.permute.xlu1 %1048  ;;  %v1425_v44 = vstv %s2998_s8 }
 0x251   : > { %v1032_v57 = vpop.permute.xlu0 %1031 }
 0x252   : > { %v1034_v58 = vadd.f32 %v1032_v57, %v1025_v51  ;;  %v1035_v59 = vadd.f32 %v1032_v57, %v1026_v46  ;;  %1334 = vrot.lane.b32.xlu1 %v1329_v50, %s2261_s3 }
 0x253   : > { %1332 = vrot.lane.b32.xlu0 %v1328_v52, %s2261_s3  ;;  %v1163_v52 = vstv %s1976_s15  ;;  %s3069_s15 = sld [smem:[#allocation7 + $0x6c]] }
 0x254   : > { %v1040_v63 = vadd.f32 %v1038_v55, %v1034_v58  ;;  %v1064_v0 = vpop.permute.xlu1 %1063  ;;  %v1041_v7 = vadd.f32 %v1039_v56, %v1035_v59  ;;  %v1164_v57 = vmul.f32 %v1163_v52, %v2471_v9  ;;  %v1745_v58 = vstv %s2959_s30  ;;  %s3139_s30 = sld [smem:[#allocation7 + $0x85]] }
 0x255   : > { %v1051_v11 = vpop.permute.xlu0 %1050  ;;  %v1188_v59 = vmul.f32 %v1186_v53, %v2449_v2  ;;  %v1427_v52 = vmul.f32 %v1425_v44, %v2457_v4  ;;  %v1619_v53 = vstv %s2019_s20  ;;  %s3185_s20 = scalar_lea.hbm %s3240_s2, %s2034_s7 }
 0x256   : > { %v1052_v12 = vsel %vm229_vm0, %v1049_v54, %v1051_v11  ;;  %v1056_v13 = vadd.f32 %v1051_v11, %v1041_v7  ;;  %1528 = vrot.lane.b32.xlu1 %v1523_v60, %s2261_s3  ;;  %v1746_v11 = vmul.f32 %v1745_v58, %v2471_v9 }
 0x257   : > { %v1055_v15 = vadd.f32 %v1052_v12, %v1040_v63  ;;  %1526 = vrot.lane.b32.xlu0 %v1522_v61, %s2261_s3  ;;  %v1551_v61 = vstv %s2961_s4  ;;  %v1380_v63 = vstv %s2963_s6  ;;  %s3153_s4 = sld [smem:[#allocation7 + $0x86]]  ;;  %s2031_s6 = sld [smem:[#allocation7 + $0x87]] }
 0x258   : > { %v1077_v18 = vpop.permute.xlu1 %1076  ;;  %v1552_v12 = vmul.f32 %v1551_v61, %v2471_v9  ;;  %v1381_v17 = vmul.f32 %v1380_v63, %v2446_v1 }
 0x259   : > { %v1066_v19 = vpop.permute.xlu0 %1065 }
 0x25a   : > { %v1067_v20 = vsel %vm245_vm1, %v1064_v0, %v1066_v19  ;;  %v1071_v21 = vadd.f32 %v1066_v19, %v1056_v13  ;;  %1722 = vrot.lane.b32.xlu1 %v1717_v14, %s2261_s3  ;;  %v1382_v14 = vmul.f32 %v1380_v63, %v2449_v2 }
 0x25b   : > { %v1070_v24 = vadd.f32 %v1067_v20, %v1055_v15  ;;  %1720 = vrot.lane.b32.xlu0 %v1716_v16, %s2261_s3  ;;  %s2944_s3 = sld [smem:[#allocation7 + $0x5f]] }
 0x25c   : > { %v1080_v28 = vadd.f32 %v1077_v18, %v1071_v21  ;;  %v1096_v29 = vpop.permute.xlu1 %1095 }
 0x25d   : > { %v1079_v30 = vadd.f32 %v1077_v18, %v1070_v24  ;;  %v1094_v31 = vpop.permute.xlu0 %1093 }
 0x25e   : > { %v1086_v33 = vadd.f32 %v1084_v22, %v1080_v28  ;;  %v1097_v34 = vsel %vm229_vm0, %v1094_v31, %v1096_v29  ;;  %1155 = vrot.lane.b32.xlu1 %v1150_v23, %s2260_s17  ;;  %v1576_v23 = vmul.f32 %v1574_v10, %v2449_v2 }
 0x25f   : > { %v1085_v36 = vadd.f32 %v1083_v25, %v1079_v30  ;;  %1153 = vrot.lane.b32.xlu0 %v1149_v26, %s2260_s17  ;;  %v1575_v26 = vmul.f32 %v1574_v10, %v2446_v1 }
 0x260   : > { %v2946_v38 = vadd.f32 %v1096_v29, %v1086_v33  ;;  %v1198_v39 = vpop.permute.xlu1 %1197 }
 0x261   : > { %v2948_v40 = vadd.f32 %v1097_v34, %v1085_v36  ;;  %v2950_v41 = vpop.permute.xlu0 %1108  ;;  %v1357_v50 = vstv %s2944_s3  ;;  %s3065_s3 = sld [smem:[#allocation7 + $0x7c]] }
 0x262   : > { %1349 = vrot.lane.b32.xlu1 %v1344_v35, %s2260_s17  ;;  %v1358_v56 = vmul.f32 %v1357_v50, %v2471_v9 }
 0x263   : > { %1347 = vrot.lane.b32.xlu0 %v1343_v32, %s2260_s17 }
 0x264   : > { %v1392_v45 = vpop.permute.xlu1 %1391 }
 0x265   : > { %v1200_v46 = vpop.permute.xlu0 %1199 }
 0x266   : > { %v1201_v47 = vsel %vm229_vm0, %v1198_v39, %v1200_v46  ;;  %1543 = vrot.lane.b32.xlu1 %v1538_v42, %s2260_s17  ;;  %v1205_v13 = vadd.f32 %v1200_v46, %v1188_v59 }
 0x267   : > { %1541 = vrot.lane.b32.xlu0 %v1537_v43, %s2260_s17  ;;  %v1204_v16 = vadd.f32 %v1201_v47, %v1187_v62  ;;  %v1621_v62 = vmul.f32 %v1619_v53, %v2457_v4 }
 0x268   : > { %v1586_v51 = vpop.permute.xlu1 %1585 }
 0x269   : > { %v1394_v54 = vpop.permute.xlu0 %1393 }
 0x26a   : > { %v1395_v55 = vsel %vm229_vm0, %v1392_v45, %v1394_v54  ;;  %1737 = vrot.lane.b32.xlu1 %v1732_v48, %s2260_s17  ;;  %v1399_v22 = vadd.f32 %v1394_v54, %v1382_v14 }
 0x26b   : > { %1735 = vrot.lane.b32.xlu0 %v1731_v49, %s2260_s17  ;;  %s2990_s17 = sld [smem:[#allocation7 + $0x54]]  ;;  %v1398_v25 = vadd.f32 %v1395_v55, %v1381_v17 }
 0x26c   : > { %v1213_v60 = vpop.permute.xlu1 %1212 }
 0x26d   : > { %v1588_v0 = vpop.permute.xlu0 %1587 }
 0x26e   : > { %v1589_v7 = vsel %vm229_vm0, %v1586_v51, %v1588_v0  ;;  %1360 = vrot.lane.b32.xlu1 %v1358_v56, %s2262_s23  ;;  %v1593_v31 = vadd.f32 %v1588_v0, %v1576_v23  ;;  %v1426_v56 = vmul.f32 %v1425_v44, %v2454_v3  ;;  %v1620_v0 = vmul.f32 %v1619_v53, %v2454_v3 }
 0x26f   : > { %1166 = vrot.lane.b32.xlu0 %v1164_v57, %s2262_s23  ;;  %v1592_v35 = vadd.f32 %v1589_v7, %v1575_v26 }
 0x270   : > { %v1407_v15 = vpop.permute.xlu1 %1406 }
 0x271   : > { %v1215_v18 = vpop.permute.xlu0 %1214  ;;  %v1231_v33 = vstv %s2990_s17  ;;  %s1782_s17 = sshll.u32 %s2443_s27, 4  ;;  %s3187_s17 = int_to_ptr.vmem [resolvable:$true] %s1782_s17 }
 0x272   : > { %v1216_v19 = vsel %vm245_vm1, %v1213_v60, %v1215_v18  ;;  %v1220_v20 = vadd.f32 %v1215_v18, %v1205_v13  ;;  %1748 = vrot.lane.b32.xlu1 %v1746_v11, %s2262_s23  ;;  %v1233_v1 = vmul.f32 %v1231_v33, %v2457_v4  ;;  %v1232_v45 = vmul.f32 %v1231_v33, %v2454_v3 }
 0x273   : > { %v1219_v21 = vadd.f32 %v1216_v19, %v1204_v16  ;;  %1554 = vrot.lane.b32.xlu0 %v1552_v12, %s2262_s23  ;;  %s1987_s23 = sld [smem:[#allocation7 + $0x58]] }
 0x274   : > { %v1601_v24 = vpop.permute.xlu1 %1600 }
 0x275   : > { %v1409_v27 = vpop.permute.xlu0 %1408 }
 0x276   : > { %v1410_v28 = vsel %vm245_vm1, %v1407_v15, %v1409_v27  ;;  %v1414_v29 = vadd.f32 %v1409_v27, %v1399_v22 }
 0x277   : > { %v1413_v30 = vadd.f32 %v1410_v28, %v1398_v25 }
 0x278   : > { %v1226_v34 = vpop.permute.xlu1 %1225 }
 0x279   : > { %v1228_v36 = vadd.f32 %v1226_v34, %v1219_v21  ;;  %v1229_v32 = vadd.f32 %v1226_v34, %v1220_v20  ;;  %v1603_v2 = vpop.permute.xlu0 %1602 }
 0x27a   : > { %v1604_v37 = vsel %vm245_vm1, %v1601_v24, %v1603_v2  ;;  %v1608_v39 = vadd.f32 %v1603_v2, %v1593_v31 }
 0x27b   : > { %v1607_v42 = vadd.f32 %v1604_v37, %v1592_v35  ;;  %v1235_v51 = vadd.f32 %v1233_v1, %v1229_v32  ;;  %v1234_v55 = vadd.f32 %v1232_v45, %v1228_v36 }
 0x27c   : > { %v1614_v43 = vpop.permute.xlu1 %1613 }
 0x27d   : > { %v1616_v46 = vadd.f32 %v1614_v43, %v1607_v42  ;;  %v1617_v47 = vadd.f32 %v1614_v43, %v1608_v39  ;;  %v1420_v48 = vpop.permute.xlu0 %1419 }
 0x27e   : > { %v1422_v49 = vadd.f32 %v1420_v48, %v1413_v30  ;;  %v1423_v50 = vadd.f32 %v1420_v48, %v1414_v29 }
 0x27f   : > { %v1623_v15 = vadd.f32 %v1621_v62, %v1617_v47  ;;  %v1622_v17 = vadd.f32 %v1620_v0, %v1616_v46 }
 0x280   : > { %v1245_v54 = vpop.permute.xlu1 %1244  ;;  %v1429_v61 = vadd.f32 %v1427_v52, %v1423_v50  ;;  %v1428_v7 = vadd.f32 %v1426_v56, %v1422_v49 }
 0x281   : > { %v1250_v57 = vadd.f32 %v1245_v54, %v1235_v51  ;;  %v1243_v58 = vpop.permute.xlu0 %1242 }
 0x282   : > { %v1246_v59 = vsel %vm229_vm0, %v1243_v58, %v1245_v54 }
 0x283   : > { %v1249_v60 = vadd.f32 %v1246_v59, %v1234_v55 }
 0x284   : > { %v1439_v63 = vpop.permute.xlu1 %1438 }
 0x285   : > { %v1444_v11 = vadd.f32 %v1439_v63, %v1429_v61  ;;  %v1437_v12 = vpop.permute.xlu0 %1436 }
 0x286   : > { %v1440_v13 = vsel %vm229_vm0, %v1437_v12, %v1439_v63  ;;  %v1276_v63 = vstv %s1987_s23  ;;  %s2166_s23 = scalar_lea.vmem %s3187_s17, 256 }
 0x287   : > { %v1443_v14 = vadd.f32 %v1440_v13, %v1428_v7  ;;  %v1470_v7 = vstv %s2005_s19  ;;  %v1664_v13 = vstv %s2023_s24  ;;  %p2167_p2 = scmp.ne.s32.totalorder %s3187_s17, %s2166_s23  ;;  %s2264_s19 = smov [#allocation8]  }
 0x288   : > { %v1633_v16 = vpop.permute.xlu1 %1632  ;;  %s2170_s24 = sshll.u32 %s2264_s19, 4  ;;  %s2171_s24 = int_to_ptr.vmem [resolvable:$false] %s2170_s24 }
 0x289   : > { %v1638_v10 = vadd.f32 %v1633_v16, %v1623_v15  ;;  %v1631_v18 = vpop.permute.xlu0 %1630  ;;  %v1277_v15 = vmul.f32 %v1276_v63, %v2463_v6  ;;  %p2168_p6 = pnand %p2167_p2, %p3256_p13  ;;  %p2173_p1 = scmp.lt.s32.totalorder %s3187_s17, %s2171_s24 }
 0x28a   : > { %v1634_v19 = vsel %vm229_vm0, %v1631_v18, %v1633_v16  ;;  %v1472_v18 = vmul.f32 %v1470_v7, %v2461_v5 }
 0x28b   : > { %v1637_v20 = vadd.f32 %v1634_v19, %v1622_v17  ;;  %v1321_v17 = vstv %s3057_s28  ;;  %p2169_p0 = pneg %p2168_p6  ;;  %s2172_s28 = scalar_lea.vmem %s2171_s24, 512 }
 0x28c   : > { %v1260_v21 = vpop.permute.xlu1 %1259  ;;  %p2174_p9 = scmp.lt.s32.totalorder %s2172_s28, %s2166_s23 }
 0x28d   : > { %v1265_v22 = vadd.f32 %v1260_v21, %v1250_v57  ;;  %v1258_v4 = vpop.permute.xlu0 %1257 }
 0x28e   : > { %v1261_v23 = vsel %vm245_vm1, %v1258_v4, %v1260_v21  ;;  %v1665_v21 = vmul.f32 %v1664_v13, %v2463_v6  ;;  %v1666_v4 = vmul.f32 %v1664_v13, %v2461_v5  ;;  %p2175_p8 = por %p2174_p9, %p2173_p1 }
 0x28f   : > { %v1264_v3 = vadd.f32 %v1261_v23, %v1249_v60 }
 0x290   : > { %v1454_v24 = vpop.permute.xlu1 %1453  ;;  %p2176_p4 = pnand %p2175_p8, %p2169_p0 }
 0x291   : > { %v3015_v25 = vadd.f32 %v1454_v24, %v1444_v11  ;;  %v1452_v26 = vpop.permute.xlu0 %1451 }
 0x292   : > { %v1455_v27 = vsel %vm245_vm1, %v1452_v26, %v1454_v24 }
 0x293   : > { %v1458_v28 = vadd.f32 %v1455_v27, %v1443_v14  ;;  %v1278_v14 = vmul.f32 %v1276_v63, %v2461_v5  ;;  %v1709_v27 = vstv %s3065_s3 }
 0x294   : > { %v1648_v29 = vpop.permute.xlu1 %1647 }
 0x295   : > { %v1653_v30 = vadd.f32 %v1648_v29, %v1638_v10  ;;  %v1646_v31 = vpop.permute.xlu0 %1645  ;;  %v1471_v10 = vmul.f32 %v1470_v7, %v2463_v6  ;;  %v1323_v6 = vmul.f32 %v1321_v17, %v2471_v9 }
 0x296   : > { %v1649_v33 = vsel %vm245_vm1, %v1646_v31, %v1648_v29 }
 0x297   : > { %v1652_v34 = vadd.f32 %v1649_v33, %v1637_v20 }
 0x298   : > { %v1465_v35 = vpop.permute.xlu1 %1464 }
 0x299   : > { %v1271_v36 = vpop.permute.xlu0 %1270  ;;  %v1467_v20 = vadd.f32 %v1465_v35, %v1458_v28  ;;  %v1468_v29 = vadd.f32 %v1465_v35, %v3015_v25  ;;  %v3097_v25 = vmul.f32 %v1709_v27, %v2468_v8  ;;  %v1515_v35 = vstv %s3069_s15 }
 0x29a   : > { %v1274_v12 = vadd.f32 %v1271_v36, %v1265_v22  ;;  %v1273_v16 = vadd.f32 %v1271_v36, %v1264_v3  ;;  %v1127_v22 = vstv %s3061_s18  ;;  %v1322_v3 = vmul.f32 %v1321_v17, %v2468_v8 }
 0x29b   : > { %v1128_v33 = vmul.f32 %v1127_v22, %v2468_v8 }
 0x29c   : > { %v1288_v32 = vpop.permute.xlu1 %1287  ;;  %v1280_v24 = vadd.f32 %v1278_v14, %v1274_v12  ;;  %v1474_v12 = vadd.f32 %v1472_v18, %v1468_v29 }
 0x29d   : > { %v1659_v2 = vpop.permute.xlu0 %1658 }
 0x29e   : > { %v3019_v37 = vadd.f32 %v1659_v2, %v1652_v34  ;;  %v3021_v39 = vadd.f32 %v1659_v2, %v1653_v30  ;;  %v1279_v30 = vadd.f32 %v1277_v15, %v1273_v16  ;;  %v1129_v34 = vmul.f32 %v1127_v22, %v2471_v9 }
 0x2a0   : > { %v3023_v42 = vpop.permute.xlu1 %1481  ;;  %v1668_v13 = vadd.f32 %v1666_v4, %v3021_v39  ;;  %v1517_v4 = vmul.f32 %v1515_v35, %v2471_v9 }
 0x2a1   : > { %v1290_v1 = vpop.permute.xlu0 %1289 }
 0x2a2   : > { %v1291_v26 = vsel %vm229_vm0, %v1288_v32, %v1290_v1  ;;  %v1295_v31 = vadd.f32 %v1290_v1, %v1280_v24  ;;  %v1473_v32 = vadd.f32 %v1471_v10, %v1467_v20  ;;  %v1711_v10 = vmul.f32 %v1709_v27, %v2471_v9 }
 0x2a3   : > { %v1294_v2 = vadd.f32 %v1291_v26, %v1279_v30 }
 0x2a4   : > { %v3025_v43 = vpop.permute.xlu1 %1675 }
 0x2a5   : > { %v3027_v44 = vpop.permute.xlu0 %1483 }
 0x2a6   : > { %v1489_v39 = vadd.f32 %v3027_v44, %v1474_v12 }
 0x2a8   : > { %v3029_v45 = vpop.permute.xlu1 %1110 }
 0x2a9   : > { %v3031_v46 = vpop.permute.xlu0 %1677  ;;  %v1112_v28 = vsel %vm245_vm1, %v2950_v41, %v3029_v45  ;;  %v1485_v41 = vsel %vm229_vm0, %v3023_v42, %v3027_v44 }
 0x2aa   : > { %v1115_v1 = vadd.f32 %v1112_v28, %v2948_v40  ;;  %v1679_v14 = vsel %vm229_vm0, %v3025_v43, %v3031_v46  ;;  %v1488_v17 = vadd.f32 %v1485_v41, %v1473_v32  ;;  %v1683_v18 = vadd.f32 %v3031_v46, %v1668_v13 }
 0x2ab   : > { %v1172_v28 = vstv %s3106_s16 }
 0x2ac   : > { %v1305_v47 = vpop.permute.xlu1 %1304 }
 0x2ad   : > { %v1303_v48 = vpop.permute.xlu0 %1302  ;;  %v1310_v7 = vadd.f32 %v1305_v47, %v1295_v31 }
 0x2ae   : > { %v1306_v5 = vsel %vm245_vm1, %v1303_v48, %v1305_v47  ;;  %v1116_v48 = vadd.f32 %v3029_v45, %v2946_v38  ;;  %v1667_v47 = vadd.f32 %v1665_v21, %v3019_v37 }
 0x2af   : > { %v1309_v15 = vadd.f32 %v1306_v5, %v1294_v2 }
 0x2b0   : > { %v3033_v49 = vpop.permute.xlu1 %1498  ;;  %v1682_v22 = vadd.f32 %v1679_v14, %v1667_v47 }
 0x2b1   : > { %v3035_v50 = vpop.permute.xlu0 %1496 }
 0x2b2   : > { %v1500_v42 = vsel %vm245_vm1, %v3035_v50, %v3033_v49  ;;  %v1516_v50 = vmul.f32 %v1515_v35, %v2468_v8 }
 0x2b3   : > { %v1503_v24 = vadd.f32 %v1500_v42, %v1488_v17 }
 0x2b4   : > { %v3037_v51 = vpop.permute.xlu1 %1692 }
 0x2b5   : > { %v3039_v52 = vpop.permute.xlu0 %1690 }
 0x2b6   : > { %v1694_v44 = vsel %vm245_vm1, %v3039_v52, %v3037_v51 }
 0x2b7   : > { %v1697_v31 = vadd.f32 %v1694_v44, %v1682_v22 }
 0x2b8   : > { %v3041_v53 = vpop.permute.xlu1 %1315 }
 0x2b9   : > { %v3043_v54 = vpop.permute.xlu0 %1121  ;;  %v1319_v40 = vadd.f32 %v3041_v53, %v1310_v7  ;;  %v1318_v20 = vadd.f32 %v3041_v53, %v1309_v15 }
 0x2ba   : > { %v1124_v16 = vadd.f32 %v3043_v54, %v1115_v1  ;;  %v1125_v38 = vadd.f32 %v3043_v54, %v1116_v48  ;;  %v1504_v54 = vadd.f32 %v3033_v49, %v1489_v39 }
 0x2bb   : > { %v1325_v53 = vadd.f32 %v1323_v6, %v1319_v40  ;;  %v1324_v29 = vadd.f32 %v1322_v3, %v1318_v20  ;;  %v1698_v6 = vadd.f32 %v3037_v51, %v1683_v18  ;;  %v1560_v18 = vstv %s3153_s4 }
 0x2bc   : > { %v3045_v55 = vpop.permute.xlu1 %1703  ;;  %v1130_v46 = vadd.f32 %v1128_v33, %v1124_v16  ;;  %v1131_v21 = vadd.f32 %v1129_v34, %v1125_v38 }
 0x2bd   : > { %v3047_v56 = vpop.permute.xlu0 %1509  ;;  %v1707_v34 = vadd.f32 %v3045_v55, %v1698_v6 }
 0x2be   : > { %v1512_v8 = vadd.f32 %v3047_v56, %v1503_v24  ;;  %v1513_v9 = vadd.f32 %v3047_v56, %v1504_v54  ;;  %v1754_v54 = vstv %s2031_s6 }
 0x2bf   : > { %v1713_v42 = vadd.f32 %v1711_v10, %v1707_v34 }
 0x2c0   : > { %v3049_v57 = vpop.permute.xlu1 %1140  ;;  %v1518_v32 = vadd.f32 %v1516_v50, %v1512_v8  ;;  %v1519_v51 = vadd.f32 %v1517_v4, %v1513_v9 }
 0x2c1   : > { %v3051_v58 = vpop.permute.xlu0 %1138  ;;  %v1146_v52 = vadd.f32 %v3049_v57, %v1131_v21 }
 0x2c2   : > { %v1142_v37 = vsel %vm229_vm0, %v3051_v58, %v3049_v57  ;;  %v1706_v57 = vadd.f32 %v3045_v55, %v1697_v31 }
 0x2c3   : > { %v1145_v30 = vadd.f32 %v1142_v37, %v1130_v46 }
 0x2c4   : > { %v3053_v59 = vpop.permute.xlu1 %1334  ;;  %v1712_v15 = vadd.f32 %v3097_v25, %v1706_v57 }
 0x2c5   : > { %v3055_v60 = vpop.permute.xlu0 %1332  ;;  %v1340_v56 = vadd.f32 %v3053_v59, %v1325_v53 }
 0x2c6   : > { %v1336_v49 = vsel %vm229_vm0, %v3055_v60, %v3053_v59 }
 0x2c7   : > { %v1339_v60 = vadd.f32 %v1336_v49, %v1324_v29 }
 0x2c8   : > { %v3059_v61 = vpop.permute.xlu1 %1528 }
 0x2c9   : > { %v3063_v62 = vpop.permute.xlu0 %1526 }
 0x2cc   : > { %v3067_v0 = vpop.permute.xlu1 %1722 }
 0x2cd   : > { %v3071_v11 = vpop.permute.xlu0 %1720 }
 0x2ce   : > { %v1724_v48 = vsel %vm229_vm0, %v3071_v11, %v3067_v0  ;;  %v1728_v11 = vadd.f32 %v3067_v0, %v1713_v42 }
 0x2cf   : > { %v1727_v38 = vadd.f32 %v1724_v48, %v1712_v15 }
 0x2d0   : > { %v3078_v19 = vpop.permute.xlu1 %1155 }
 0x2d1   : > { %v1154_v23 = vpop.permute.xlu0 %1153  ;;  %v1161_v33 = vadd.f32 %v3078_v19, %v1146_v52 }
 0x2d2   : > { %v1157_v27 = vsel %vm245_vm1, %v1154_v23, %v3078_v19  ;;  %v1530_v23 = vsel %vm229_vm0, %v3063_v62, %v3059_v61  ;;  %v1534_v62 = vadd.f32 %v3059_v61, %v1519_v51 }
 0x2d3   : > { %v1160_v3 = vadd.f32 %v1157_v27, %v1145_v30  ;;  %v1533_v19 = vadd.f32 %v1530_v23, %v1518_v32 }
 0x2d4   : > { %v3094_v36 = vpop.permute.xlu1 %1349 }
 0x2d5   : > { %v1348_v63 = vpop.permute.xlu0 %1347  ;;  %v1355_v59 = vadd.f32 %v3094_v36, %v1340_v56 }
 0x2d6   : > { %v1351_v5 = vsel %vm245_vm1, %v1348_v63, %v3094_v36  ;;  %v1366_v36 = vstv %s3139_s30 }
 0x2d7   : > { %v1354_v63 = vadd.f32 %v1351_v5, %v1339_v60 }
 0x2d8   : > { %v1544_v45 = vpop.permute.xlu1 %1543 }
 0x2d9   : > { %v1542_v43 = vpop.permute.xlu0 %1541  ;;  %v1549_v16 = vadd.f32 %v1544_v45, %v1534_v62 }
 0x2da   : > { %v1545_v55 = vsel %vm245_vm1, %v1542_v43, %v1544_v45 }
 0x2db   : > { %v1548_v61 = vadd.f32 %v1545_v55, %v1533_v19 }
 0x2dc   : > { %v1738_v26 = vpop.permute.xlu1 %1737 }
 0x2dd   : > { %v1736_v58 = vpop.permute.xlu0 %1735  ;;  %v1743_v20 = vadd.f32 %v1738_v26, %v1728_v11 }
 0x2de   : > { %v1739_v47 = vsel %vm245_vm1, %v1736_v58, %v1738_v26 }
 0x2df   : > { %v1742_v50 = vadd.f32 %v1739_v47, %v1727_v38 }
 0x2e0   : > { %v1361_v2 = vpop.permute.xlu1 %1360 }
 0x2e1   : > { %v1167_v35 = vpop.permute.xlu0 %1166  ;;  %v1363_v7 = vadd.f32 %v1361_v2, %v1354_v63  ;;  %v1364_v12 = vadd.f32 %v1361_v2, %v1355_v59 }
 0x2e2   : > { %v1169_v41 = vadd.f32 %v1167_v35, %v1160_v3  ;;  %v1170_v1 = vadd.f32 %v1167_v35, %v1161_v33 }
 0x2e3   : > { %v1367_v17 = vadd.f32 %v1366_v36, %v1363_v7  ;;  %v1368_v39 = vadd.f32 %v1366_v36, %v1364_v12 }
 0x2e4   : > { %v1173_v13 = vadd.f32 %v1172_v28, %v1169_v41  ;;  %v1174_v14 = vadd.f32 %v1172_v28, %v1170_v1  ;;  %v1749_v10 = vpop.permute.xlu1 %1748 }
 0x2e5   : > { %v1555_v40 = vpop.permute.xlu0 %1554  ;;  %v1751_v45 = vadd.f32 %v1749_v10, %v1742_v50  ;;  %v1752_v4 = vadd.f32 %v1749_v10, %v1743_v20 }
 0x2e6   : > { %1179 = vrot.lane.b32.xlu1 %v1174_v14, %s2263_s26  ;;  %1177 = vrot.lane.b32.xlu0 %v1173_v13, %s2263_s26  ;;  %v1557_v43 = vadd.f32 %v1555_v40, %v1548_v61  ;;  %v1558_v25 = vadd.f32 %v1555_v40, %v1549_v16 }
 0x2e7   : > { %v1755_v24 = vadd.f32 %v1754_v54, %v1751_v45  ;;  %v1756_v37 = vadd.f32 %v1754_v54, %v1752_v4 }
 0x2e8   : > { %v1561_v22 = vadd.f32 %v1560_v18, %v1557_v43  ;;  %v1562_v0 = vadd.f32 %v1560_v18, %v1558_v25 }
 0x2ea   : > { %1373 = vrot.lane.b32.xlu1 %v1368_v39, %s2263_s26  ;;  %1371 = vrot.lane.b32.xlu0 %v1367_v17, %s2263_s26 }
 0x2ee   : > { %1567 = vrot.lane.b32.xlu1 %v1562_v0, %s2263_s26  ;;  %1565 = vrot.lane.b32.xlu0 %v1561_v22, %s2263_s26 }
 0x2f2   : > { %1761 = vrot.lane.b32.xlu1 %v1756_v37, %s2263_s26  ;;  %1759 = vrot.lane.b32.xlu0 %v1755_v24, %s2263_s26 }
 0x358   : > { %v1180_v44 = vpop.permute.xlu1 %1179  ;;  %v1178_v46 = vpop.permute.xlu0 %1177 }
 0x359   : > { %v1181_v21 = vsel %vm405_vm2, %v1178_v46, %v1180_v44 }
 0x35a   : > { %1978 = vst [vmem:[%s2443_s27 + $0x8] sm:$0x3] %v1181_v21 }
 0x35c   : > { %v1374_v53 = vpop.permute.xlu1 %1373  ;;  %v1372_v26 = vpop.permute.xlu0 %1371 }
 0x35d   : > { %v1375_v8 = vsel %vm405_vm2, %v1372_v26, %v1374_v53 }
 0x35e   : > { %1996 = vst [vmem:[%s2443_s27 + $0xa] sm:$0x3] %v1375_v8 }
 0x360   : > { %v1568_v9 = vpop.permute.xlu1 %1567  ;;  %v1566_v49 = vpop.permute.xlu0 %1565 }
 0x361   : > { %v1569_v27 = vsel %vm405_vm2, %v1566_v49, %v1568_v9 }
 0x362   : > { %2014 = vst [vmem:[%s2443_s27 + $0xc] sm:$0x3] %v1569_v27 }
 0x364   : > { %v1762_v58 = vpop.permute.xlu1 %1761  ;;  %v1760_v29 = vpop.permute.xlu0 %1759 }
 0x365   : > { %v1763_v52 = vsel %vm405_vm2, %v1760_v29, %v1762_v58 }
 0x366   : > { %2032 = vst [vmem:[%s2443_s27 + $0xe] sm:$0x3] %v1763_v52 }
 0x367   : > { %2179 = shalt.err (!%p2176_p4)
}
 0x368   : > { %s2180_s27 = scalar_lea.hbm %s3185_s20, 256  ;;  %s2184_s15 = scalar_lea.hbm %s3240_s2, 512 }
 0x369   : > { %p2181_p10 = scmp.ne.s32.totalorder %s3185_s20, %s2180_s27  ;;  %p2185_p3 = scmp.lt.u32.totalorder %s3185_s20, %s3240_s2 }
 0x36a   : > { %p2186_p7 = scmp.lt.u32.totalorder %s2184_s15, %s2180_s27  ;;  %p2188_p2 = scmp.lt.u32.totalorder %s2180_s27, %s3185_s20 }
 0x36b   : > { %p2182_p11 = pnand %p2181_p10, %p3256_p13 }
 0x36c   : > { %p2187_p12 = por %p2186_p7, %p2185_p3 }
 0x36d   : > { %p2183_p5 = pneg %p2182_p11 }
 0x36e   : > { %p2189_p6 = por %p2188_p2, %p2187_p12 }
 0x370   : > { %p2190_p0 = pnand %p2189_p6, %p2183_p5 }
 0x372   : > { %2193 = shalt.err (!%p2190_p0)
}
 0x373   : > { %s2265_s4 = smov 32   ;;  %s2266_s6 = smov 64  }
 0x374   : > { %s2267_s7 = smov 2  }
 0x375   : > { %2043 = dma.vmem_to_hbm [thread:$0]  (%p3256_p13), %s3187_s17, 256, %s3185_s20, %s1768_s12, %s2265_s4, %s2266_s6, %s2267_s7  }
 0x376 PF: > { %s1797_s26 = sand.u32 1, %s2232_s9   ;;  %p3257_p1 = scmp.ne.s32.totalorder %s3249_s22, 0 }
 0x377   : > { %p3258_p9 = scmp.ge.s32.totalorder %s2252_s14, 2  ;;  %s1798_s8 = scalar_lea.sflag [#allocation5], %s1797_s26 }
 0x379   : > { %p2054_p8 = pnand %p3258_p9, %p3257_p1 }
 0x37b   : > { %2227 = dma.done.wait (!%p2054_p8), %s1798_s8, 256  }
 0x37c   : > { %2229 = vsyncadd (!%p2054_p8), %s1798_s8, 4294967040  ;;  %s19_s14 = sadd.s32 1, %s2252_s14   ;;  %s3259_s9 = smov %s2236_s10 }
 0x37d   : > { %p16_p4 = scmp.ge.s32.totalorder %s19_s14, 4   ;;  %s3260_s10 = smov %s2240_s11 }
 0x37e   : > { %s3261_s11 = smov %s2393_s25  ;;  %s3262_s12 = smov %s2248_s13 }
 0x37f   : > { %s3263_s13 = smov %s3265_s29  ;;  %18 = sbr.rel (!%p16_p4) target bundleno = 7 (0x7), region = 89 }
 0x386   :  { %1803 = vsyncpa [#allocation4], 1 }
 0x387   :  { %1805 = vsyncpa [#allocation4 + $0x1], 1 }
 0x388   :  { %1806 = vsyncpa [#allocation5], 1 }
 0x389   :  { %1808 = vsyncpa [#allocation5 + $0x1], 1 }
 0x38a   :  { %1809 = vsyncpa [#allocation6], 1 }
 0x38b   :  { %1811 = vsyncpa [#allocation6 + $0x1], 1 }

</bundles_post_ra>
